<compile_context>
chip_gen: v5e
topology: v5e:2x2
jax: 0.10.0
libtpu: 0.0.40
codegen_flags: <defaults>
</compile_context>

<pallas_src>
import jax
import jax.numpy as jnp
from jax.experimental import pallas as pl
from jax.experimental.pallas import tpu as pltpu

IN_DIM = 28 * 28      # 784 == full array dim, so the (8,128) BlockSpec rule holds
HID1 = 512
HID2 = 512
OUT_DIM = 10
OUT_PAD = 128         # lane-dense logits (avoid masked vst on a 10-wide output)


def mlp_kernel(x_ref, w1_ref, b1_ref, w2_ref, b2_ref, w3_ref, b3_ref, o_ref):
    # fc1 + relu: in-kernel bf16 cast of x, K=784 dot, f32 accumulation
    x = x_ref[...].astype(jnp.bfloat16)
    h1 = jnp.dot(x, w1_ref[...], preferred_element_type=jnp.float32)
    h1 = jnp.maximum(h1 + b1_ref[...], 0.0)
    # dropout(p=0.2) -> identity at inference
    # TODO(synk): training-mode dropout (pltpu.prng_random_bits mask + 1/(1-p)
    #             scaling) is not implemented here.
    # fc2 + relu
    h2 = jnp.dot(h1.astype(jnp.bfloat16), w2_ref[...],
                 preferred_element_type=jnp.float32)
    h2 = jnp.maximum(h2 + b2_ref[...], 0.0)
    # fc3 logits (padded to 128 lanes; padded w3 columns / b3 lanes are zero)
    o_ref[...] = (
        jnp.dot(h2.astype(jnp.bfloat16), w3_ref[...],
                preferred_element_type=jnp.float32) + b3_ref[...]
    ).astype(o_ref.dtype)


def _pick_batch_tile(B, tb_max):
    """Batch tile selection (tb_max must be a multiple of 128).

    - tiny batches: one tile rounded up to 16 rows (bf16 sublane packing)
    - huge batches (>= 2*tb_max): full tb_max tiles, long grid
    - mid-size: keep >= 2 grid steps so both v7x TensorCores get work,
      tile a multiple of 128 (MXU-aligned M)
    """
    if B < 256:
        return max(16, pl.cdiv(B, 16) * 16)
    if B >= 2 * tb_max:
        return tb_max
    return max(128, (B // 2) // 128 * 128)


def net_forward(x, params, *, tb_max=512):
    """x: (B, 1, 28, 28) or (B, 784) float32. Returns (B, 10) f32 logits."""
    w1, b1, w2, b2, w3, b3 = params
    x2d = x.reshape(-1, IN_DIM).astype(jnp.float32)
    B = x2d.shape[0]

    tb = _pick_batch_tile(B, tb_max)
    B_pad = pl.cdiv(B, tb) * tb
    if B_pad != B:
        x2d = jnp.pad(x2d, ((0, B_pad - B), (0, 0)))

    # one-time wrapper-side weight casts / pads (~1.5 MiB of bf16 total)
    w1p = w1.astype(jnp.bfloat16)
    w2p = w2.astype(jnp.bfloat16)
    w3p = jnp.pad(w3.astype(jnp.bfloat16), ((0, 0), (0, OUT_PAD - OUT_DIM)))
    b1p = b1.astype(jnp.float32)
    b2p = b2.astype(jnp.float32)
    b3p = jnp.pad(b3.astype(jnp.float32), ((0, 0), (0, OUT_PAD - OUT_DIM)))

    # weights/biases stay VMEM-resident across the batch grid (constant index_map)
    resident = lambda shape: pl.BlockSpec(shape, lambda i: (0, 0))

    out = pl.pallas_call(
        mlp_kernel,
        out_shape=jax.ShapeDtypeStruct((B_pad, OUT_PAD), jnp.bfloat16),
        grid=(B_pad // tb,),
        in_specs=[
            pl.BlockSpec((tb, IN_DIM), lambda i: (i, 0)),   # pipelined x tile (f32)
            resident((IN_DIM, HID1)),
            resident((1, HID1)),
            resident((HID1, HID2)),
            resident((1, HID2)),
            resident((HID2, OUT_PAD)),
            resident((1, OUT_PAD)),
        ],
        out_specs=pl.BlockSpec((tb, OUT_PAD), lambda i: (i, 0)),
        compiler_params=pltpu.CompilerParams(
            dimension_semantics=("parallel",)),
    )(x2d, w1p, b1p, w2p, b2p, w3p, b3p)

    return out[:B, :OUT_DIM].astype(jnp.float32)


def init_params(key):
    """Deterministic init mimicking nn.Linear: U(-1/sqrt(fan_in), 1/sqrt(fan_in)).

    Weights are stored as (in_features, out_features) so the kernel computes
    x @ W + b directly (transposed relative to torch's nn.Linear.weight).
    """
    def linear(key, fan_in, fan_out):
        kw, kb = jax.random.split(key)
        bound = 1.0 / (fan_in ** 0.5)
        w = jax.random.uniform(kw, (fan_in, fan_out), jnp.float32, -bound, bound)
        b = jax.random.uniform(kb, (1, fan_out), jnp.float32, -bound, bound)
        return w, b

    k1, k2, k3 = jax.random.split(key, 3)
    w1, b1 = linear(k1, IN_DIM, HID1)
    w2, b2 = linear(k2, HID1, HID2)
    w3, b3 = linear(k3, HID2, OUT_DIM)
    return (w1, b1, w2, b2, w3, b3)


if __name__ == "__main__":
    key = jax.random.PRNGKey(0)
    kx, kp = jax.random.split(key)

    B = 8
    x = jax.random.normal(kx, (B, 1, 28, 28), jnp.float32)  # NCHW like torch MNIST
    params = init_params(kp)

    logits = net_forward(x, params)
    jax.block_until_ready(logits)
    assert logits.shape == (B, OUT_DIM)

    # reference mirroring the kernel numerics: bf16 operands, f32 accumulate,
    # bf16 output store
    w1, b1, w2, b2, w3, b3 = params
    bf = lambda a: a.astype(jnp.bfloat16).astype(jnp.float32)
    xf = bf(x.reshape(-1, IN_DIM))
    ref = jnp.maximum(xf @ bf(w1) + b1, 0.0)
    ref = jnp.maximum(bf(ref) @ bf(w2) + b2, 0.0)
    ref = bf(bf(ref) @ bf(w3) + b3)
    assert jnp.allclose(logits, ref, atol=2e-2, rtol=2e-2), (
        float(jnp.max(jnp.abs(logits - ref))))

    # loose check against the pure-f32 math as well
    xf32 = x.reshape(-1, IN_DIM)
    ref32 = jnp.maximum(xf32 @ w1 + b1, 0.0)
    ref32 = jnp.maximum(ref32 @ w2 + b2, 0.0)
    ref32 = ref32 @ w3 + b3
    assert jnp.allclose(logits, ref32, atol=1e-1, rtol=1e-1)

    print("KERNEL_OK")
</pallas_src>

<mosaic_0001>
module attributes {stable_mosaic.version = 11 : i64} {
  func.func @mlp_kernel(%arg0: i32, %arg1: memref<16x784xf32, #tpu.memory_space<vmem>>, %arg2: memref<784x512xbf16, #tpu.memory_space<vmem>>, %arg3: memref<1x512xf32, #tpu.memory_space<vmem>>, %arg4: memref<512x512xbf16, #tpu.memory_space<vmem>>, %arg5: memref<1x512xf32, #tpu.memory_space<vmem>>, %arg6: memref<512x128xbf16, #tpu.memory_space<vmem>>, %arg7: memref<1x128xf32, #tpu.memory_space<vmem>>, %arg8: memref<16x128xbf16, #tpu.memory_space<vmem>>) attributes {dimension_semantics = [#tpu.dimension_semantics<parallel>], iteration_bounds = array<i64: 1>, scalar_prefetch = 0 : i64, scratch_operands = 0 : i64, tpu.core_type = #tpu.core_type<tc>, window_params = [{transform_indices = @transform_0, window_bounds = array<i64: 16, 784>}, {pipeline_mode = #tpu.pipeline_mode<synchronous>, transform_indices = @transform_1, window_bounds = array<i64: 784, 512>}, {pipeline_mode = #tpu.pipeline_mode<synchronous>, transform_indices = @transform_2, window_bounds = array<i64: 1, 512>}, {pipeline_mode = #tpu.pipeline_mode<synchronous>, transform_indices = @transform_3, window_bounds = array<i64: 512, 512>}, {pipeline_mode = #tpu.pipeline_mode<synchronous>, transform_indices = @transform_4, window_bounds = array<i64: 1, 512>}, {pipeline_mode = #tpu.pipeline_mode<synchronous>, transform_indices = @transform_5, window_bounds = array<i64: 512, 128>}, {pipeline_mode = #tpu.pipeline_mode<synchronous>, transform_indices = @transform_6, window_bounds = array<i64: 1, 128>}, {transform_indices = @transform_7, window_bounds = array<i64: 16, 128>}]} {
    %c0 = arith.constant 0 : index
    %c0_0 = arith.constant 0 : index
    %0 = vector.load %arg1[%c0, %c0_0] : memref<16x784xf32, #tpu.memory_space<vmem>>, vector<16x784xf32>
    %1 = arith.truncf %0 : vector<16x784xf32> to vector<16x784xbf16>
    %c0_1 = arith.constant 0 : index
    %c0_2 = arith.constant 0 : index
    %2 = vector.load %arg2[%c0_1, %c0_2] : memref<784x512xbf16, #tpu.memory_space<vmem>>, vector<784x512xbf16>
    %cst = arith.constant dense<0.000000e+00> : vector<16x512xf32>
    %3 = tpu.matmul %1, %2, %cst {dimension_numbers = #tpu.dot_dimension_numbers<[1], [0], [0], [1], [0, 0, 1, 1], [], []>} : vector<16x784xbf16>, vector<784x512xbf16>, vector<16x512xf32> -> vector<16x512xf32>
    %c0_3 = arith.constant 0 : index
    %c0_4 = arith.constant 0 : index
    %4 = vector.load %arg3[%c0_3, %c0_4] : memref<1x512xf32, #tpu.memory_space<vmem>>, vector<1x512xf32>
    %5 = vector.broadcast %4 : vector<1x512xf32> to vector<16x512xf32>
    %6 = arith.addf %3, %5 : vector<16x512xf32>
    %cst_5 = arith.constant 0.000000e+00 : f32
    %7 = vector.broadcast %cst_5 : f32 to vector<16x512xf32>
    %8 = arith.maximumf %6, %7 : vector<16x512xf32>
    %9 = arith.truncf %8 : vector<16x512xf32> to vector<16x512xbf16>
    %c0_6 = arith.constant 0 : index
    %c0_7 = arith.constant 0 : index
    %10 = vector.load %arg4[%c0_6, %c0_7] : memref<512x512xbf16, #tpu.memory_space<vmem>>, vector<512x512xbf16>
    %cst_8 = arith.constant dense<0.000000e+00> : vector<16x512xf32>
    %11 = tpu.matmul %9, %10, %cst_8 {dimension_numbers = #tpu.dot_dimension_numbers<[1], [0], [0], [1], [0, 0, 1, 1], [], []>} : vector<16x512xbf16>, vector<512x512xbf16>, vector<16x512xf32> -> vector<16x512xf32>
    %c0_9 = arith.constant 0 : index
    %c0_10 = arith.constant 0 : index
    %12 = vector.load %arg5[%c0_9, %c0_10] : memref<1x512xf32, #tpu.memory_space<vmem>>, vector<1x512xf32>
    %13 = vector.broadcast %12 : vector<1x512xf32> to vector<16x512xf32>
    %14 = arith.addf %11, %13 : vector<16x512xf32>
    %cst_11 = arith.constant 0.000000e+00 : f32
    %15 = vector.broadcast %cst_11 : f32 to vector<16x512xf32>
    %16 = arith.maximumf %14, %15 : vector<16x512xf32>
    %17 = arith.truncf %16 : vector<16x512xf32> to vector<16x512xbf16>
    %c0_12 = arith.constant 0 : index
    %c0_13 = arith.constant 0 : index
    %18 = vector.load %arg6[%c0_12, %c0_13] : memref<512x128xbf16, #tpu.memory_space<vmem>>, vector<512x128xbf16>
    %cst_14 = arith.constant dense<0.000000e+00> : vector<16x128xf32>
    %19 = tpu.matmul %17, %18, %cst_14 {dimension_numbers = #tpu.dot_dimension_numbers<[1], [0], [0], [1], [0, 0, 1, 1], [], []>} : vector<16x512xbf16>, vector<512x128xbf16>, vector<16x128xf32> -> vector<16x128xf32>
    %c0_15 = arith.constant 0 : index
    %c0_16 = arith.constant 0 : index
    %20 = vector.load %arg7[%c0_15, %c0_16] : memref<1x128xf32, #tpu.memory_space<vmem>>, vector<1x128xf32>
    %21 = vector.broadcast %20 : vector<1x128xf32> to vector<16x128xf32>
    %22 = arith.addf %19, %21 : vector<16x128xf32>
    %23 = arith.truncf %22 : vector<16x128xf32> to vector<16x128xbf16>
    %c0_17 = arith.constant 0 : index
    %c0_18 = arith.constant 0 : index
    %24 = vector.load %arg8[%c0_17, %c0_18] : memref<16x128xbf16, #tpu.memory_space<vmem>>, vector<16x128xbf16>
    tpu.vector_store %arg8[%c0_17, %c0_18], %23 {strides = array<i32>} : memref<16x128xbf16, #tpu.memory_space<vmem>>, vector<16x128xbf16>,
    return
  }
  func.func @transform_0(%arg0: i32) -> (i32, i32) {
    %c0_i32 = arith.constant 0 : i32
    %c0_i32_0 = arith.constant 0 : i32
    return %arg0, %c0_i32 : i32, i32
  }
  func.func @transform_1(%arg0: i32) -> (i32, i32) {
    %c0_i32 = arith.constant 0 : i32
    %c0_i32_0 = arith.constant 0 : i32
    %c0_i32_1 = arith.constant 0 : i32
    return %c0_i32, %c0_i32_0 : i32, i32
  }
  func.func @transform_2(%arg0: i32) -> (i32, i32) {
    %c0_i32 = arith.constant 0 : i32
    %c0_i32_0 = arith.constant 0 : i32
    %c0_i32_1 = arith.constant 0 : i32
    return %c0_i32, %c0_i32_0 : i32, i32
  }
  func.func @transform_3(%arg0: i32) -> (i32, i32) {
    %c0_i32 = arith.constant 0 : i32
    %c0_i32_0 = arith.constant 0 : i32
    %c0_i32_1 = arith.constant 0 : i32
    return %c0_i32, %c0_i32_0 : i32, i32
  }
  func.func @transform_4(%arg0: i32) -> (i32, i32) {
    %c0_i32 = arith.constant 0 : i32
    %c0_i32_0 = arith.constant 0 : i32
    %c0_i32_1 = arith.constant 0 : i32
    return %c0_i32, %c0_i32_0 : i32, i32
  }
  func.func @transform_5(%arg0: i32) -> (i32, i32) {
    %c0_i32 = arith.constant 0 : i32
    %c0_i32_0 = arith.constant 0 : i32
    %c0_i32_1 = arith.constant 0 : i32
    return %c0_i32, %c0_i32_0 : i32, i32
  }
  func.func @transform_6(%arg0: i32) -> (i32, i32) {
    %c0_i32 = arith.constant 0 : i32
    %c0_i32_0 = arith.constant 0 : i32
    %c0_i32_1 = arith.constant 0 : i32
    return %c0_i32, %c0_i32_0 : i32, i32
  }
  func.func @transform_7(%arg0: i32) -> (i32, i32) {
    %c0_i32 = arith.constant 0 : i32
    %c0_i32_0 = arith.constant 0 : i32
    return %arg0, %c0_i32 : i32, i32
  }
}

</mosaic_0001>

<bundles_post_ra>
// kernel: tpu_custom_call.1
= control target key start
LH: loop header
LB: loop body
LE: loop exit
PB: predicated region body
PF: predicated region fallthrough
CT: control target
= control target key end

     0   :  { %12 = vsyncpa [#allocation3], 0  ;;  %s5256_s0 = inlined_call_operand.hbm [shape: f32[16,784], index: 0, kind: input, shape index: {}]   ;;  %s5257_s1 = inlined_call_operand.hbm [shape: bf16[784,512], index: 1, kind: input, shape index: {}]   ;;  %s5258_s2 = inlined_call_operand.hbm [shape: f32[1,512], index: 2, kind: input, shape index: {}]   ;;  %s5259_s3 = inlined_call_operand.hbm [shape: bf16[512,512], index: 3, kind: input, shape index: {}]   ;;  %s5260_s4 = inlined_call_operand.hbm [shape: f32[1,512], index: 4, kind: input, shape index: {}]   ;;  %s5261_s5 = inlined_call_operand.hbm [shape: bf16[512,128], index: 5, kind: input, shape index: {}]   ;;  %s5262_s6 = inlined_call_operand.vmem [shape: f32[1,128], index: 6, kind: input, shape index: {}]   ;;  %s5263_s7 = inlined_call_operand.hbm [shape: bf16[16,128], index: 7, kind: output, shape index: {}]  }
   0x1   :  { %13 = vsyncpa [#allocation6], 0 }
   0x2   :  { %14 = vsyncpa [#allocation9], 0 }
   0x3   :  { %15 = vsyncpa [#allocation12], 0  ;;  %s34_s26 = sshll.u32 %s5257_s1, 4  ;;  %s35_s26 = int_to_ptr.hbm [resolvable:$true] %s34_s26 }
   0x4   :  { %16 = vsyncpa [#allocation4], 0  ;;  %s5070_s27 = smov [#allocation5]   ;;  %s58_s8 = sshll.u32 %s5259_s3, 4  ;;  %s59_s8 = int_to_ptr.hbm [resolvable:$true] %s58_s8 }
   0x5   :  { %s36_s28 = sshll.u32 %s5070_s27, 4  ;;  %s5071_s9 = smov 256   ;;  %s37_s28 = int_to_ptr.vmem [resolvable:$true] %s36_s28 }
   0x6   :  { %s5072_s10 = smov 16   ;;  %s5073_s11 = smov [#allocation8]  }
   0x7   :  { %42 = dma.hbm_to_vmem [thread:$0]  %s35_s26, 25088, %s37_s28, [#allocation6], %s5071_s9, %s5071_s9, %s5072_s10  }
   0x8   :  { %s60_s12 = sshll.u32 %s5073_s11, 4  ;;  %s21_s15 = sshll.u32 %s5256_s0, 4  ;;  %s61_s12 = int_to_ptr.vmem [resolvable:$true] %s60_s12  ;;  %s22_s15 = int_to_ptr.hbm [resolvable:$true] %s21_s15 }
   0x9   :  { %66 = dma.hbm_to_vmem [thread:$0]  %s59_s8, 16384, %s61_s12, [#allocation9], %s5071_s9, %s5071_s9, %s5072_s10  }
   0xa   :  { %s5074_s1 = smov [#allocation2]   ;;  %s48_s3 = sshll.u32 %s5258_s2, 4  ;;  %s49_s3 = int_to_ptr.hbm [resolvable:$true] %s48_s3 }
   0xb   :  { %s23_s16 = sshll.u32 %s5074_s1, 4  ;;  %s5075_s19 = smov 896   ;;  %s24_s16 = int_to_ptr.vmem [resolvable:$true] %s23_s16 }
   0xc   :  { %s5076_s20 = smov 56   ;;  %s5077_s21 = smov [#allocation7]  }
   0xd   :  { %29 = dma.hbm_to_vmem [thread:$0]  %s22_s15, 1792, %s24_s16, [#allocation3], %s5075_s19, %s5075_s19, %s5076_s20  }
   0xe   :  { %s50_s22 = sshll.u32 %s5077_s21, 4  ;;  %s72_s0 = sshll.u32 %s5260_s4, 4  ;;  %s51_s22 = int_to_ptr.vmem [resolvable:$true] %s50_s22  ;;  %s73_s0 = int_to_ptr.hbm [resolvable:$true] %s72_s0 }
   0xf   :  { %53 = dma.hbm_to_vmem [thread:$0]  %s49_s3, 64, %s51_s22, [#allocation6]  }
  0x10   :  { %s82_s27 = sshll.u32 %s5261_s5, 4  ;;  %s5078_s28 = smov [#allocation10]   ;;  %s83_s27 = int_to_ptr.hbm [resolvable:$true] %s82_s27 }
  0x11   :  { %s74_s29 = sshll.u32 %s5078_s28, 4  ;;  %s5079_s2 = smov [#allocation11]   ;;  %s75_s29 = int_to_ptr.vmem [resolvable:$true] %s74_s29 }
  0x12   :  { %77 = dma.hbm_to_vmem [thread:$0]  %s73_s0, 64, %s75_s29, [#allocation9]  }
  0x13   :  { %s84_s30 = sshll.u32 %s5079_s2, 4  ;;  %s5080_s8 = smov 64   ;;  %s85_s30 = int_to_ptr.vmem [resolvable:$true] %s84_s30 }
  0x14   :  { %s5081_s9 = smov 4  }
  0x15   :  { %90 = dma.hbm_to_vmem [thread:$0]  %s83_s27, 4096, %s85_s30, [#allocation12], %s5080_s8, %s5080_s8, %s5081_s9  }
  0x16   :  { %5060 = dma.done.wait [#allocation3], 1792  }
  0x17   :  { %5061 = vsyncadd [#allocation3], 4294965504 }
  0x18   :  { %5062 = dma.done.wait [#allocation6], 25152  }
  0x19   :  { %5063 = vsyncadd [#allocation6], 4294942144 }
  0x1a   :  { %5064 = dma.done.wait [#allocation9], 16448  }
  0x1b   :  { %5065 = vsyncadd [#allocation9], 4294950848 }
  0x1c   :  { %5066 = dma.done.wait [#allocation12], 4096  }
  0x1d   :  { %5067 = vsyncadd [#allocation12], 4294963200  ;;  %v3203_v0 = vld [vmem:[#allocation5 + $0xe0] sm:$0xf]  ;;  %v4547_v1 = vld [vmem:[#allocation5 + $0xec] sm:$0xf0] }
  0x1e   :  { %v3331_v2 = vld [vmem:[#allocation5 + $0x1e0] sm:$0xf]  ;;  %v3204_v3 = vor.u32 %v4547_v1, %v3203_v0  ;;  %v4579_v4 = vld [vmem:[#allocation5 + $0x1ec] sm:$0xf0]  ;;  %vm1325_vm0 = vcmask 130048   ;;  %s5082_s10 = smov [#allocation13]  }
  0x1f   :  { %v3459_v5 = vld [vmem:[#allocation5 + $0x2e0] sm:$0xf]  ;;  %v4611_v6 = vld [vmem:[#allocation5 + $0x2ec] sm:$0xf0]  ;;  %v3332_v7 = vor.u32 %v4579_v4, %v3331_v2  ;;  %s3071_s11 = sshll.u32 %s5082_s10, 4  ;;  %s3073_s14 = sshll.u32 %s5263_s7, 4  ;;  %s3072_s11 = int_to_ptr.vmem [resolvable:$true] %s3071_s11  ;;  %s3074_s14 = int_to_ptr.hbm [resolvable:$true] %s3073_s14 }
  0x20   :  { %v3460_v8 = vor.u32 %v4611_v6, %v3459_v5  ;;  %v3587_v9 = vld [vmem:[#allocation5 + $0x3e0] sm:$0xf]  ;;  %v4643_v10 = vld [vmem:[#allocation5 + $0x3ec] sm:$0xf0]  ;;  %1329 = vmatpush.bf16.msra.mxu0 %v3204_v3 }
  0x21   :  { %v3187_v11 = vld [vmem:[#allocation5 + $0xc0] sm:$0xf]  ;;  %v3588_v12 = vor.u32 %v4643_v10, %v3587_v9  ;;  %v4543_v13 = vld [vmem:[#allocation5 + $0xcc] sm:$0xf0]  ;;  %1343 = vmatpush.bf16.msra.mxu1 %v3332_v7 }
  0x22   :  { %v3315_v14 = vld [vmem:[#allocation5 + $0x1c0] sm:$0xf]  ;;  %v4575_v15 = vld [vmem:[#allocation5 + $0x1cc] sm:$0xf0]  ;;  %1357 = vmatpush.bf16.msra.mxu2 %v3460_v8  ;;  %v3188_v16 = vor.u32 %v4543_v13, %v3187_v11 }
  0x23   :  { %v3316_v17 = vor.u32 %v4575_v15, %v3315_v14  ;;  %v3443_v18 = vld [vmem:[#allocation5 + $0x2c0] sm:$0xf]  ;;  %v4607_v19 = vld [vmem:[#allocation5 + $0x2cc] sm:$0xf0]  ;;  %1371 = vmatpush.bf16.msra.mxu3 %v3588_v12 }
  0x24   :  { %v3571_v20 = vld [vmem:[#allocation5 + $0x3c0] sm:$0xf]  ;;  %v3444_v21 = vor.u32 %v4607_v19, %v3443_v18  ;;  %v4639_v22 = vld [vmem:[#allocation5 + $0x3cc] sm:$0xf0]  ;;  %1330 = vmatpush.bf16.msra.mxu0 %v3188_v16 }
  0x25   :  { %v3171_v23 = vld [vmem:[#allocation5 + $0xa0] sm:$0xf]  ;;  %v4539_v24 = vld [vmem:[#allocation5 + $0xac] sm:$0xf0]  ;;  %v3572_v25 = vor.u32 %v4639_v22, %v3571_v20  ;;  %1344 = vmatpush.bf16.msra.mxu1 %v3316_v17 }
  0x26   :  { %v3299_v26 = vld [vmem:[#allocation5 + $0x1a0] sm:$0xf]  ;;  %v4571_v27 = vld [vmem:[#allocation5 + $0x1ac] sm:$0xf0]  ;;  %v3172_v29 = vor.u32 %v4539_v24, %v3171_v23  ;;  %1358 = vmatpush.bf16.msra.mxu2 %v3444_v21 }
  0x27   :  { %v3427_v28 = vld [vmem:[#allocation5 + $0x2a0] sm:$0xf]  ;;  %v4603_v30 = vld [vmem:[#allocation5 + $0x2ac] sm:$0xf0]  ;;  %v3300_v33 = vor.u32 %v4571_v27, %v3299_v26  ;;  %1372 = vmatpush.bf16.msra.mxu3 %v3572_v25 }
  0x28   :  { %v3555_v31 = vld [vmem:[#allocation5 + $0x3a0] sm:$0xf]  ;;  %v4635_v32 = vld [vmem:[#allocation5 + $0x3ac] sm:$0xf0]  ;;  %v3428_v34 = vor.u32 %v4603_v30, %v3427_v28  ;;  %1331 = vmatpush.bf16.msra.mxu0 %v3172_v29 }
  0x29   :  { %v3155_v35 = vld [vmem:[#allocation5 + $0x80] sm:$0xf]  ;;  %v4535_v36 = vld [vmem:[#allocation5 + $0x8c] sm:$0xf0]  ;;  %v3556_v38 = vor.u32 %v4635_v32, %v3555_v31  ;;  %1345 = vmatpush.bf16.msra.mxu1 %v3300_v33  ;;  %v4545_v32 = vld [vmem:[#allocation5 + $0xe4] sm:$0xf] }
  0x2a   :  { %v3283_v37 = vld [vmem:[#allocation5 + $0x180] sm:$0xf]  ;;  %v4567_v39 = vld [vmem:[#allocation5 + $0x18c] sm:$0xf0]  ;;  %v3156_v44 = vor.u32 %v4535_v36, %v3155_v35  ;;  %1359 = vmatpush.bf16.msra.mxu2 %v3428_v34  ;;  %v3205_v33 = vld [vmem:[#allocation5 + $0xf0] sm:$0xf0] }
  0x2b   :  { %v3411_v40 = vld [vmem:[#allocation5 + $0x280] sm:$0xf]  ;;  %v4599_v41 = vld [vmem:[#allocation5 + $0x28c] sm:$0xf0]  ;;  %v3284_v45 = vor.u32 %v4567_v39, %v3283_v37  ;;  %1373 = vmatpush.bf16.msra.mxu3 %v3556_v38  ;;  %v127_v36 = vld [vmem:[#allocation2 + $0x48] sm:$0xff] }
  0x2c   :  { %v3539_v42 = vld [vmem:[#allocation5 + $0x380] sm:$0xf]  ;;  %v4631_v43 = vld [vmem:[#allocation5 + $0x38c] sm:$0xf0]  ;;  %v3412_v46 = vor.u32 %v4599_v41, %v3411_v40  ;;  %1332 = vmatpush.bf16.msra.mxu0 %v3156_v44  ;;  %v4577_v41 = vld [vmem:[#allocation5 + $0x1e4] sm:$0xf] }
  0x2d   :  { %v3139_v47 = vld [vmem:[#allocation5 + $0x60] sm:$0xf]  ;;  %v4531_v48 = vld [vmem:[#allocation5 + $0x6c] sm:$0xf0]  ;;  %v3540_v50 = vor.u32 %v4631_v43, %v3539_v42  ;;  %1346 = vmatpush.bf16.msra.mxu1 %v3284_v45  ;;  %v125_v43 = vld [vmem:[#allocation2 + $0x38] sm:$0xff] }
  0x2e   :  { %v3267_v49 = vld [vmem:[#allocation5 + $0x160] sm:$0xf]  ;;  %v4563_v51 = vld [vmem:[#allocation5 + $0x16c] sm:$0xf0]  ;;  %v3140_v56 = vor.u32 %v4531_v48, %v3139_v47  ;;  %1360 = vmatpush.bf16.msra.mxu2 %v3412_v46  ;;  %v3333_v46 = vld [vmem:[#allocation5 + $0x1f0] sm:$0xf0] }
  0x2f   :  { %v3395_v52 = vld [vmem:[#allocation5 + $0x260] sm:$0xf]  ;;  %v4595_v53 = vld [vmem:[#allocation5 + $0x26c] sm:$0xf0]  ;;  %v3268_v57 = vor.u32 %v4563_v51, %v3267_v49  ;;  %1374 = vmatpush.bf16.msra.mxu3 %v3540_v50  ;;  %v121_v47 = vld [vmem:[#allocation2 + $0x18] sm:$0xff]  ;;  %v3208_v50 = vor.u32 %v4545_v32, %v3205_v33 }
  0x30   :  { %v3523_v54 = vld [vmem:[#allocation5 + $0x360] sm:$0xf]  ;;  %v4627_v55 = vld [vmem:[#allocation5 + $0x36c] sm:$0xf0]  ;;  %v3396_v58 = vor.u32 %v4595_v53, %v3395_v52  ;;  %1333 = vmatpush.bf16.msra.mxu0 %v3140_v56 }
  0x31   :  { %v3123_v59 = vld [vmem:[#allocation5 + $0x40] sm:$0xf]  ;;  %v4527_v60 = vld [vmem:[#allocation5 + $0x4c] sm:$0xf0]  ;;  %v3524_v62 = vor.u32 %v4627_v55, %v3523_v54  ;;  %1347 = vmatpush.bf16.msra.mxu1 %v3268_v57  ;;  %v4541_v57 = vld [vmem:[#allocation5 + $0xc4] sm:$0xf] }
  0x32   :  { %v3251_v61 = vld [vmem:[#allocation5 + $0x140] sm:$0xf]  ;;  %v4559_v63 = vld [vmem:[#allocation5 + $0x14c] sm:$0xf0]  ;;  %v3124_v4 = vor.u32 %v4527_v60, %v3123_v59  ;;  %1361 = vmatpush.bf16.msra.mxu2 %v3396_v58  ;;  %v3189_v58 = vld [vmem:[#allocation5 + $0xd0] sm:$0xf0] }
  0x33   :  { %v3379_v0 = vld [vmem:[#allocation5 + $0x240] sm:$0xf]  ;;  %v4591_v1 = vld [vmem:[#allocation5 + $0x24c] sm:$0xf0]  ;;  %v3252_v6 = vor.u32 %v4559_v63, %v3251_v61  ;;  %1375 = vmatpush.bf16.msra.mxu3 %v3524_v62  ;;  %v119_v61 = vld [vmem:[#allocation2 + $0x8] sm:$0xff]  ;;  %v3336_v63 = vor.u32 %v4577_v41, %v3333_v46 }
  0x34   :  { %v3507_v2 = vld [vmem:[#allocation5 + $0x340] sm:$0xf]  ;;  %v4623_v3 = vld [vmem:[#allocation5 + $0x34c] sm:$0xf0]  ;;  %v3380_v7 = vor.u32 %v4591_v1, %v3379_v0  ;;  %1334 = vmatpush.bf16.msra.mxu0 %v3124_v4  ;;  %v4573_v1 = vld [vmem:[#allocation5 + $0x1c4] sm:$0xf]  ;;  %v3192_v4 = vor.u32 %v4541_v57, %v3189_v58 }
  0x35   :  { %v3107_v5 = vld [vmem:[#allocation5 + $0x20] sm:$0xf]  ;;  %v4523_v8 = vld [vmem:[#allocation5 + $0x2c] sm:$0xf0]  ;;  %v3508_v11 = vor.u32 %v4623_v3, %v3507_v2  ;;  %1348 = vmatpush.bf16.msra.mxu1 %v3252_v6  ;;  %v3317_v2 = vld [vmem:[#allocation5 + $0x1d0] sm:$0xf0] }
  0x36   :  { %v3235_v9 = vld [vmem:[#allocation5 + $0x120] sm:$0xf]  ;;  %v4555_v10 = vld [vmem:[#allocation5 + $0x12c] sm:$0xf0]  ;;  %v3108_v18 = vor.u32 %v4523_v8, %v3107_v5  ;;  %1362 = vmatpush.bf16.msra.mxu2 %v3380_v7  ;;  %v3269_v41 = vld [vmem:[#allocation5 + $0x170] sm:$0xf0] }
  0x37   :  { %v3363_v12 = vld [vmem:[#allocation5 + $0x220] sm:$0xf]  ;;  %v4587_v13 = vld [vmem:[#allocation5 + $0x22c] sm:$0xf0]  ;;  %v3236_v23 = vor.u32 %v4555_v10, %v3235_v9  ;;  %1376 = vmatpush.bf16.msra.mxu3 %v3508_v11  ;;  %v4537_v10 = vld [vmem:[#allocation5 + $0xa4] sm:$0xf] }
  0x38   :  { %v3491_v14 = vld [vmem:[#allocation5 + $0x320] sm:$0xf]  ;;  %v4619_v15 = vld [vmem:[#allocation5 + $0x32c] sm:$0xf0]  ;;  %v3364_v24 = vor.u32 %v4587_v13, %v3363_v12  ;;  %1335 = vmatpush.bf16.msra.mxu0 %v3108_v18  ;;  %v3173_v11 = vld [vmem:[#allocation5 + $0xb0] sm:$0xf0]  ;;  %v3320_v12 = vor.u32 %v4573_v1, %v3317_v2 }
  0x39   :  { %v3091_v16 = vld [vmem:[#allocation5] sm:$0xf]  ;;  %v4519_v17 = vld [vmem:[#allocation5 + $0xc] sm:$0xf0]  ;;  %v3492_v28 = vor.u32 %v4619_v15, %v3491_v14  ;;  %1349 = vmatpush.bf16.msra.mxu1 %v3236_v23  ;;  %v4569_v14 = vld [vmem:[#allocation5 + $0x1a4] sm:$0xf] }
  0x3a   :  { %v3219_v19 = vld [vmem:[#allocation5 + $0x100] sm:$0xf]  ;;  %v4551_v20 = vld [vmem:[#allocation5 + $0x10c] sm:$0xf0]  ;;  %v3092_v35 = vor.u32 %v4519_v17, %v3091_v16  ;;  %1363 = vmatpush.bf16.msra.mxu2 %v3364_v24  ;;  %v3301_v15 = vld [vmem:[#allocation5 + $0x1b0] sm:$0xf0]  ;;  %v3176_v17 = vor.u32 %v4537_v10, %v3173_v11 }
  0x3b   :  { %v3347_v21 = vld [vmem:[#allocation5 + $0x200] sm:$0xf]  ;;  %v4583_v22 = vld [vmem:[#allocation5 + $0x20c] sm:$0xf0]  ;;  %v3220_v39 = vor.u32 %v4551_v20, %v3219_v19  ;;  %1377 = vmatpush.bf16.msra.mxu3 %v3492_v28  ;;  %v3157_v23 = vld [vmem:[#allocation5 + $0x90] sm:$0xf0]  ;;  %v3304_v24 = vor.u32 %v4569_v14, %v3301_v15 }
  0x3c   :  { %v3475_v25 = vld [vmem:[#allocation5 + $0x300] sm:$0xf]  ;;  %v4615_v26 = vld [vmem:[#allocation5 + $0x30c] sm:$0xf0]  ;;  %v3348_v40 = vor.u32 %v4583_v22, %v3347_v21  ;;  %1336 = vmatpush.bf16.msra.mxu0 %v3092_v35  ;;  %v4533_v22 = vld [vmem:[#allocation5 + $0x84] sm:$0xf] }
  0x3d   :  { %v3715_v27 = vld [vmem:[#allocation5 + $0x4e0] sm:$0xf]  ;;  %v4675_v29 = vld [vmem:[#allocation5 + $0x4ec] sm:$0xf0]  ;;  %v3476_v44 = vor.u32 %v4615_v26, %v3475_v25  ;;  %1350 = vmatpush.bf16.msra.mxu1 %v3220_v39  ;;  %v4565_v26 = vld [vmem:[#allocation5 + $0x184] sm:$0xf] }
  0x3e   :  { %v3843_v30 = vld [vmem:[#allocation5 + $0x5e0] sm:$0xf]  ;;  %v4707_v31 = vld [vmem:[#allocation5 + $0x5ec] sm:$0xf0]  ;;  %v3716_v45 = vor.u32 %v4675_v29, %v3715_v27  ;;  %1364 = vmatpush.bf16.msra.mxu2 %v3348_v40  ;;  %v3285_v27 = vld [vmem:[#allocation5 + $0x190] sm:$0xf0]  ;;  %v3160_v29 = vor.u32 %v4533_v22, %v3157_v23 }
  0x3f   :  { %v120_v34 = vld [vmem:[#allocation2 + $0x10] sm:$0xff]  ;;  %v4711_v38 = vld [vmem:[#allocation5 + $0x60c] sm:$0xf0]  ;;  %v3844_v49 = vor.u32 %v4707_v31, %v3843_v30  ;;  %1378 = vmatpush.bf16.msra.mxu3 %v3476_v44  ;;  %v3141_v35 = vld [vmem:[#allocation5 + $0x70] sm:$0xf0] }
  0x40   :  { %v3859_v37 = vld [vmem:[#allocation5 + $0x600] sm:$0xf]  ;;  %v118_v42 = vld [vmem:[#allocation2] sm:$0xff]  ;;  %v5144_v54 = vpack.c.bf16 %v127_v36, %v120_v34  ;;  %1385 = vmatpush.bf16.msrb.mxu0 %v3716_v45  ;;  %v4529_v34 = vld [vmem:[#allocation5 + $0x64] sm:$0xf] }
  0x41   :  { %v128_v48 = vld [vmem:[#allocation2 + $0x50] sm:$0xff]  ;;  %v4671_v52 = vld [vmem:[#allocation5 + $0x4cc] sm:$0xf0]  ;;  %v5146_v55 = vpack.c.bf16 %v125_v43, %v118_v42  ;;  %v3860_v59 = vor.u32 %v4711_v38, %v3859_v37  ;;  %1399 = vmatpush.bf16.msrb.mxu1 %v3844_v49  ;;  %v131_v37 = vld [vmem:[#allocation2 + $0x68] sm:$0xff]  ;;  %v3288_v38 = vor.u32 %v4565_v26, %v3285_v27  ;;  %v3144_v43 = vor.u32 %v4529_v34, %v3141_v35 }
  0x42   :  { %v3699_v51 = vld [vmem:[#allocation5 + $0x4c0] sm:$0xf]  ;;  %v4703_v56 = vld [vmem:[#allocation5 + $0x5cc] sm:$0xf0]  ;;  %v5148_v60 = vpack.c.bf16 %v128_v48, %v121_v47  ;;  %1365 = vmatmul.bf16.vlgmr.msra.gmra.mxu2 %v5144_v54  ;;  %v4561_v40 = vld [vmem:[#allocation5 + $0x164] sm:$0xf] }
  0x43   :  { %v3827_v53 = vld [vmem:[#allocation5 + $0x5c0] sm:$0xf]  ;;  %v126_v62 = vld [vmem:[#allocation2 + $0x40] sm:$0xff]  ;;  %v3700_v0 = vor.u32 %v4671_v52, %v3699_v51  ;;  %1427 = vmatpush.bf16.msrb.mxu3 %v3208_v50  ;;  %1337 = vmatmul.bf16.vlgmr.msra.gmra.mxu0 %v5146_v55  ;;  %v4525_v48 = vld [vmem:[#allocation5 + $0x44] sm:$0xf]  ;;  %v3272_v51 = vor.u32 %v4561_v40, %v3269_v41 }
  0x44   :  { %v3828_v3 = vor.u32 %v4703_v56, %v3827_v53  ;;  %v3683_v5 = vld [vmem:[#allocation5 + $0x4a0] sm:$0xf]  ;;  %v4667_v6 = vld [vmem:[#allocation5 + $0x4ac] sm:$0xf0]  ;;  %v5152_v8 = vpack.c.bf16 %v126_v62, %v119_v61  ;;  %1420 = vmatpush.bf16.msrb.mxu2 %v3860_v59  ;;  %1379 = vmatmul.bf16.vlgmr.msra.gmra.mxu3 %v5148_v60  ;;  %v3125_v49 = vld [vmem:[#allocation5 + $0x50] sm:$0xf0] }
  0x45   :  { %v3811_v7 = vld [vmem:[#allocation5 + $0x5a0] sm:$0xf]  ;;  %v4699_v9 = vld [vmem:[#allocation5 + $0x5ac] sm:$0xf0]  ;;  %1386 = vmatpush.bf16.msrb.mxu0 %v3700_v0  ;;  %v3684_v13 = vor.u32 %v4667_v6, %v3683_v5  ;;  %v4557_v53 = vld [vmem:[#allocation5 + $0x144] sm:$0xf]  ;;  %v3128_v58 = vor.u32 %v4525_v48, %v3125_v49 }
  0x46   :  { %1400 = vmatpush.bf16.msrb.mxu1 %v3828_v3  ;;  %v3812_v16 = vor.u32 %v4699_v9, %v3811_v7  ;;  %v3667_v18 = vld [vmem:[#allocation5 + $0x480] sm:$0xf]  ;;  %v4663_v19 = vld [vmem:[#allocation5 + $0x48c] sm:$0xf0]  ;;  %v3253_v56 = vld [vmem:[#allocation5 + $0x150] sm:$0xf0] }
  0x47   :  { %1428 = vmatpush.bf16.msrb.mxu3 %v3192_v4  ;;  %v3795_v20 = vld [vmem:[#allocation5 + $0x580] sm:$0xf]  ;;  %1351 = vmatmul.bf16.vlgmr.msra.gmra.mxu1 %v5152_v8  ;;  %v4695_v21 = vld [vmem:[#allocation5 + $0x58c] sm:$0xf0]  ;;  %v3668_v25 = vor.u32 %v4663_v19, %v3667_v18  ;;  %v4521_v0 = vld [vmem:[#allocation5 + $0x24] sm:$0xf]  ;;  %v3256_v4 = vor.u32 %v4557_v53, %v3253_v56 }
  0x48   :  { %1441 = vmatpush.bf16.msra.mxu2 %v3336_v63  ;;  %v3796_v28 = vor.u32 %v4695_v21, %v3795_v20  ;;  %v3651_v30 = vld [vmem:[#allocation5 + $0x460] sm:$0xf]  ;;  %v4659_v31 = vld [vmem:[#allocation5 + $0x46c] sm:$0xf0]  ;;  %v3109_v1 = vld [vmem:[#allocation5 + $0x30] sm:$0xf0] }
  0x49   :  { %1387 = vmatpush.bf16.msrb.mxu0 %v3684_v13  ;;  %v3779_v32 = vld [vmem:[#allocation5 + $0x560] sm:$0xf]  ;;  %v4691_v33 = vld [vmem:[#allocation5 + $0x56c] sm:$0xf0]  ;;  %v3652_v39 = vor.u32 %v4659_v31, %v3651_v30  ;;  %v4553_v2 = vld [vmem:[#allocation5 + $0x124] sm:$0xf]  ;;  %v3112_v11 = vor.u32 %v4521_v0, %v3109_v1 }
  0x4a   :  { %1401 = vmatpush.bf16.msrb.mxu1 %v3812_v16  ;;  %v124_v36 = vld [vmem:[#allocation2 + $0x30] sm:$0xff]  ;;  %v3780_v42 = vor.u32 %v4691_v33, %v3779_v32  ;;  %v4655_v45 = vld [vmem:[#allocation5 + $0x44c] sm:$0xf0]  ;;  %v3237_v3 = vld [vmem:[#allocation5 + $0x130] sm:$0xf0] }
  0x4b   :  { %1429 = vmatpush.bf16.msrb.mxu3 %v3176_v17  ;;  %v3635_v44 = vld [vmem:[#allocation5 + $0x440] sm:$0xf]  ;;  %v4687_v47 = vld [vmem:[#allocation5 + $0x54c] sm:$0xf0]  ;;  %v5156_v50 = vpack.c.bf16 %v131_v37, %v124_v36  ;;  %v4517_v13 = vld [vmem:[#allocation5 + $0x4] sm:$0xf]  ;;  %v3240_v21 = vor.u32 %v4553_v2, %v3237_v3 }
  0x4c   :  { %1442 = vmatpush.bf16.msra.mxu2 %v3320_v12  ;;  %v3763_v46 = vld [vmem:[#allocation5 + $0x540] sm:$0xf]  ;;  %v3636_v52 = vor.u32 %v4655_v45, %v3635_v44  ;;  %v4651_v61 = vld [vmem:[#allocation5 + $0x42c] sm:$0xf0]  ;;  %v3093_v14 = vld [vmem:[#allocation5 + $0x10] sm:$0xf0] }
  0x4d   :  { %1388 = vmatpush.bf16.msrb.mxu0 %v3668_v25  ;;  %v3764_v57 = vor.u32 %v4687_v47, %v3763_v46  ;;  %v3619_v59 = vld [vmem:[#allocation5 + $0x420] sm:$0xf]  ;;  %v4683_v63 = vld [vmem:[#allocation5 + $0x52c] sm:$0xf0]  ;;  %v4609_v15 = vld [vmem:[#allocation5 + $0x2e4] sm:$0xf]  ;;  %v3096_v27 = vor.u32 %v4517_v13, %v3093_v14 }
  0x4e   :  { %1402 = vmatpush.bf16.msrb.mxu1 %v3796_v28  ;;  %v3747_v62 = vld [vmem:[#allocation5 + $0x520] sm:$0xf]  ;;  %v3620_v5 = vor.u32 %v4651_v61, %v3619_v59  ;;  %v4647_v7 = vld [vmem:[#allocation5 + $0x40c] sm:$0xf0]  ;;  %v3461_v16 = vld [vmem:[#allocation5 + $0x2f0] sm:$0xf0] }
  0x4f   :  { %1430 = vmatpush.bf16.msrb.mxu3 %v3160_v29  ;;  %v3603_v6 = vld [vmem:[#allocation5 + $0x400] sm:$0xf]  ;;  %v3748_v10 = vor.u32 %v4683_v63, %v3747_v62  ;;  %v4679_v12 = vld [vmem:[#allocation5 + $0x50c] sm:$0xf0]  ;;  %v4641_v17 = vld [vmem:[#allocation5 + $0x3e4] sm:$0xf]  ;;  %v3464_v31 = vor.u32 %v4609_v15, %v3461_v16 }
  0x50   :  { %1443 = vmatpush.bf16.msra.mxu2 %v3304_v24  ;;  %v3731_v9 = vld [vmem:[#allocation5 + $0x500] sm:$0xf]  ;;  %v3589_v18 = vld [vmem:[#allocation5 + $0x3f0] sm:$0xf0]  ;;  %v4673_v19 = vld [vmem:[#allocation5 + $0x4e4] sm:$0xf]  ;;  %v3604_v22 = vor.u32 %v4647_v7, %v3603_v6 }
  0x51   :  { %1389 = vmatpush.bf16.msrb.mxu0 %v3652_v39  ;;  %v3717_v20 = vld [vmem:[#allocation5 + $0x4f0] sm:$0xf0]  ;;  %v129_v24 = vld [vmem:[#allocation2 + $0x58] sm:$0xff]  ;;  %v4549_v25 = vld [vmem:[#allocation5 + $0x104] sm:$0xf]  ;;  %v3732_v26 = vor.u32 %v4679_v12, %v3731_v9  ;;  %v3592_v32 = vor.u32 %v4641_v17, %v3589_v18 }
  0x52   :  { %1403 = vmatpush.bf16.msrb.mxu1 %v3780_v42  ;;  %3873 = vmatmul.msk.bf16.vlgmr.msrb.gmra.mxu2 %vm1325_vm0, %v5156_v50  ;;  %v122_v23 = vld [vmem:[#allocation2 + $0x20] sm:$0xff]  ;;  %v123_v29 = vld [vmem:[#allocation2 + $0x28] sm:$0xff]  ;;  %v4705_v33 = vld [vmem:[#allocation5 + $0x5e4] sm:$0xf]  ;;  %v3720_v36 = vor.u32 %v4673_v19, %v3717_v20 }
  0x53   :  { %1431 = vmatpush.bf16.msrb.mxu3 %v3144_v43  ;;  %v3221_v28 = vld [vmem:[#allocation5 + $0x110] sm:$0xf0]  ;;  %v4605_v35 = vld [vmem:[#allocation5 + $0x2c4] sm:$0xf]  ;;  %v5160_v37 = vpack.c.bf16 %v129_v24, %v122_v23 }
  0x54   :  { %1444 = vmatpush.bf16.msra.mxu2 %v3288_v38  ;;  %v130_v30 = vld [vmem:[#allocation2 + $0x60] sm:$0xff]  ;;  %v4637_v39 = vld [vmem:[#allocation5 + $0x3c4] sm:$0xf]  ;;  %v3224_v41 = vor.u32 %v4549_v25, %v3221_v28 }
  0x55   :  { %1390 = vmatpush.bf16.msrb.mxu0 %v3636_v52  ;;  %v3845_v34 = vld [vmem:[#allocation5 + $0x5f0] sm:$0xf0]  ;;  %v5162_v42 = vpack.c.bf16 %v130_v30, %v123_v29  ;;  %v4669_v43 = vld [vmem:[#allocation5 + $0x4c4] sm:$0xf] }
  0x56   :  { %1404 = vmatpush.bf16.msrb.mxu1 %v3764_v57  ;;  %v3445_v38 = vld [vmem:[#allocation5 + $0x2d0] sm:$0xf0]  ;;  %v3848_v45 = vor.u32 %v4705_v33, %v3845_v34  ;;  %v4701_v48 = vld [vmem:[#allocation5 + $0x5c4] sm:$0xf] }
  0x57   :  { %1432 = vmatpush.bf16.msrb.mxu3 %v3128_v58  ;;  %v3573_v40 = vld [vmem:[#allocation5 + $0x3d0] sm:$0xf0]  ;;  %v3448_v46 = vor.u32 %v4605_v35, %v3445_v38  ;;  %v4633_v56 = vld [vmem:[#allocation5 + $0x3a4] sm:$0xf] }
  0x58   :  { %1445 = vmatpush.bf16.msra.mxu2 %v3272_v51  ;;  %v3701_v44 = vld [vmem:[#allocation5 + $0x4d0] sm:$0xf0]  ;;  %v3576_v47 = vor.u32 %v4637_v39, %v3573_v40  ;;  %v4601_v51 = vld [vmem:[#allocation5 + $0x2a4] sm:$0xf] }
  0x59   :  { %1391 = vmatpush.bf16.msrb.mxu0 %v3620_v5  ;;  %v3829_v49 = vld [vmem:[#allocation5 + $0x5d0] sm:$0xf0]  ;;  %v3704_v52 = vor.u32 %v4669_v43, %v3701_v44  ;;  %v4665_v58 = vld [vmem:[#allocation5 + $0x4a4] sm:$0xf] }
  0x5a   :  { %1405 = vmatpush.bf16.msrb.mxu1 %v3748_v10  ;;  %v3429_v53 = vld [vmem:[#allocation5 + $0x2b0] sm:$0xf0]  ;;  %v3832_v61 = vor.u32 %v4701_v48, %v3829_v49  ;;  %v4697_v0 = vld [vmem:[#allocation5 + $0x5a4] sm:$0xf] }
  0x5b   :  { %1433 = vmatpush.bf16.msrb.mxu3 %v3112_v11  ;;  %v3557_v57 = vld [vmem:[#allocation5 + $0x3b0] sm:$0xf0]  ;;  %v3432_v62 = vor.u32 %v4601_v51, %v3429_v53  ;;  %v4597_v2 = vld [vmem:[#allocation5 + $0x284] sm:$0xf] }
  0x5c   :  { %1446 = vmatpush.bf16.msra.mxu2 %v3256_v4  ;;  %v3685_v59 = vld [vmem:[#allocation5 + $0x4b0] sm:$0xf0]  ;;  %v3560_v63 = vor.u32 %v4633_v56, %v3557_v57  ;;  %v4629_v5 = vld [vmem:[#allocation5 + $0x384] sm:$0xf] }
  0x5d   :  { %1392 = vmatpush.bf16.msrb.mxu0 %v3604_v22  ;;  %v3813_v1 = vld [vmem:[#allocation5 + $0x5b0] sm:$0xf0]  ;;  %v3688_v3 = vor.u32 %v4665_v58, %v3685_v59  ;;  %v4661_v7 = vld [vmem:[#allocation5 + $0x484] sm:$0xf] }
  0x5e   :  { %1406 = vmatpush.bf16.msrb.mxu1 %v3732_v26  ;;  %v3413_v4 = vld [vmem:[#allocation5 + $0x290] sm:$0xf0]  ;;  %v3816_v10 = vor.u32 %v4697_v0, %v3813_v1  ;;  %v4693_v13 = vld [vmem:[#allocation5 + $0x584] sm:$0xf]  ;;  %v3211_v0 = vld [vmem:[#allocation5 + $0xe8] sm:$0xf] }
  0x5f   :  { %1434 = vmatpush.bf16.msrb.mxu3 %v3096_v27  ;;  %v3541_v6 = vld [vmem:[#allocation5 + $0x390] sm:$0xf0]  ;;  %v3416_v11 = vor.u32 %v4597_v2, %v3413_v4  ;;  %v4593_v15 = vld [vmem:[#allocation5 + $0x264] sm:$0xf]  ;;  %v4548_v1 = vld [vmem:[#allocation5 + $0xf4] sm:$0xf0] }
  0x60   :  { %1447 = vmatpush.bf16.msra.mxu2 %v3240_v21  ;;  %1393 = vmatmul.bf16.vlgmr.msrb.gmra.mxu0 %v5160_v37  ;;  %v3669_v9 = vld [vmem:[#allocation5 + $0x490] sm:$0xf0]  ;;  %v3544_v12 = vor.u32 %v4629_v5, %v3541_v6  ;;  %v4625_v18 = vld [vmem:[#allocation5 + $0x364] sm:$0xf]  ;;  %v3467_v5 = vld [vmem:[#allocation5 + $0x2e8] sm:$0xf] }
  0x61   :  { %1455 = vmatpush.bf16.msra.mxu0 %v3464_v31  ;;  %1407 = vmatmul.bf16.vlgmr.msrb.gmra.mxu1 %v5162_v42  ;;  %v3797_v14 = vld [vmem:[#allocation5 + $0x590] sm:$0xf0]  ;;  %v3672_v16 = vor.u32 %v4661_v7, %v3669_v9  ;;  %v4657_v20 = vld [vmem:[#allocation5 + $0x464] sm:$0xf]  ;;  %v4612_v6 = vld [vmem:[#allocation5 + $0x2f4] sm:$0xf0] }
  0x62   :  { %1469 = vmatpush.bf16.msra.mxu1 %v3592_v32  ;;  %1435 = vmatmul.bf16.vlgmr.msrb.gmra.mxu3 %v5146_v55  ;;  %v3397_v17 = vld [vmem:[#allocation5 + $0x270] sm:$0xf0]  ;;  %v3800_v22 = vor.u32 %v4693_v13, %v3797_v14  ;;  %v4689_v25 = vld [vmem:[#allocation5 + $0x564] sm:$0xf]  ;;  %v3212_v13 = vor.u32 %v4548_v1, %v3211_v0  ;;  %v3595_v14 = vld [vmem:[#allocation5 + $0x3e8] sm:$0xf] }
  0x63   :  { %1483 = vmatpush.bf16.msra.mxu3 %v3720_v36  ;;  %v3525_v19 = vld [vmem:[#allocation5 + $0x370] sm:$0xf0]  ;;  %v3400_v23 = vor.u32 %v4593_v15, %v3397_v17  ;;  %v4589_v27 = vld [vmem:[#allocation5 + $0x244] sm:$0xf]  ;;  %v4644_v15 = vld [vmem:[#allocation5 + $0x3f4] sm:$0xf0] }
  0x64   :  { %1448 = vmatpush.bf16.msra.mxu2 %v3224_v41  ;;  %v3653_v21 = vld [vmem:[#allocation5 + $0x470] sm:$0xf0]  ;;  %v3528_v24 = vor.u32 %v4625_v18, %v3525_v19  ;;  %v4621_v30 = vld [vmem:[#allocation5 + $0x344] sm:$0xf]  ;;  %v3339_v17 = vld [vmem:[#allocation5 + $0x1e8] sm:$0xf]  ;;  %v3468_v19 = vor.u32 %v4612_v6, %v3467_v5 }
  0x65   :  { %1456 = vmatpush.bf16.msra.mxu0 %v3448_v46  ;;  %v3781_v26 = vld [vmem:[#allocation5 + $0x570] sm:$0xf0]  ;;  %v3656_v28 = vor.u32 %v4657_v20, %v3653_v21  ;;  %v4653_v32 = vld [vmem:[#allocation5 + $0x444] sm:$0xf]  ;;  %v4580_v18 = vld [vmem:[#allocation5 + $0x1f4] sm:$0xf0] }
  0x66   :  { %1470 = vmatpush.bf16.msra.mxu1 %v3576_v47  ;;  %v3381_v29 = vld [vmem:[#allocation5 + $0x250] sm:$0xf0]  ;;  %v3784_v34 = vor.u32 %v4689_v25, %v3781_v26  ;;  %v4685_v38 = vld [vmem:[#allocation5 + $0x544] sm:$0xf]  ;;  %v3195_v21 = vld [vmem:[#allocation5 + $0xc8] sm:$0xf]  ;;  %v3340_v26 = vor.u32 %v4580_v18, %v3339_v17 }
  0x67   :  { %1484 = vmatpush.bf16.msra.mxu3 %v3704_v52  ;;  %1449 = vmatmul.bf16.vlgmr.msra.gmra.mxu2 %v5152_v8  ;;  %v3509_v31 = vld [vmem:[#allocation5 + $0x350] sm:$0xf0]  ;;  %v3384_v35 = vor.u32 %v4589_v27, %v3381_v29  ;;  %v4585_v40 = vld [vmem:[#allocation5 + $0x224] sm:$0xf]  ;;  %v4608_v25 = vld [vmem:[#allocation5 + $0x2d4] sm:$0xf0] }
  0x68   :  { %1497 = vmatpush.bf16.msrb.mxu2 %v3848_v45  ;;  %v3637_v33 = vld [vmem:[#allocation5 + $0x450] sm:$0xf0]  ;;  %v3512_v36 = vor.u32 %v4621_v30, %v3509_v31  ;;  %v4617_v44 = vld [vmem:[#allocation5 + $0x324] sm:$0xf]  ;;  %v3579_v27 = vld [vmem:[#allocation5 + $0x3c8] sm:$0xf] }
  0x69   :  { %1457 = vmatpush.bf16.msra.mxu0 %v3432_v62  ;;  %v3765_v39 = vld [vmem:[#allocation5 + $0x550] sm:$0xf0]  ;;  %v3640_v41 = vor.u32 %v4653_v32, %v3637_v33  ;;  %v4649_v46 = vld [vmem:[#allocation5 + $0x424] sm:$0xf]  ;;  %v3323_v30 = vld [vmem:[#allocation5 + $0x1c8] sm:$0xf] }
  0x6a   :  { %1471 = vmatpush.bf16.msra.mxu1 %v3560_v63  ;;  %v3365_v43 = vld [vmem:[#allocation5 + $0x230] sm:$0xf0]  ;;  %v3768_v48 = vor.u32 %v4685_v38, %v3765_v39  ;;  %v4681_v49 = vld [vmem:[#allocation5 + $0x524] sm:$0xf]  ;;  %v4576_v31 = vld [vmem:[#allocation5 + $0x1d4] sm:$0xf0] }
  0x6b   :  { %1485 = vmatpush.bf16.msra.mxu3 %v3688_v3  ;;  %v3493_v45 = vld [vmem:[#allocation5 + $0x330] sm:$0xf0]  ;;  %v3368_v52 = vor.u32 %v4585_v40, %v3365_v43  ;;  %v4581_v56 = vld [vmem:[#allocation5 + $0x204] sm:$0xf]  ;;  %v3179_v33 = vld [vmem:[#allocation5 + $0xa8] sm:$0xf]  ;;  %v3324_v39 = vor.u32 %v4576_v31, %v3323_v30 }
  0x6c   :  { %1498 = vmatpush.bf16.msrb.mxu2 %v3832_v61  ;;  %v3621_v47 = vld [vmem:[#allocation5 + $0x430] sm:$0xf0]  ;;  %v3496_v53 = vor.u32 %v4617_v44, %v3493_v45  ;;  %v4613_v58 = vld [vmem:[#allocation5 + $0x304] sm:$0xf]  ;;  %v4604_v38 = vld [vmem:[#allocation5 + $0x2b4] sm:$0xf0] }
  0x6d   :  { %1458 = vmatpush.bf16.msra.mxu0 %v3416_v11  ;;  %v3749_v51 = vld [vmem:[#allocation5 + $0x530] sm:$0xf0]  ;;  %v3624_v59 = vor.u32 %v4649_v46, %v3621_v47  ;;  %v4645_v62 = vld [vmem:[#allocation5 + $0x404] sm:$0xf]  ;;  %v3563_v40 = vld [vmem:[#allocation5 + $0x3a8] sm:$0xf] }
  0x6e   :  { %1472 = vmatpush.bf16.msra.mxu1 %v3544_v12  ;;  %v3349_v57 = vld [vmem:[#allocation5 + $0x210] sm:$0xf0]  ;;  %v4709_v2 = vld [vmem:[#allocation5 + $0x604] sm:$0xf]  ;;  %v3752_v3 = vor.u32 %v4681_v49, %v3749_v51  ;;  %v3307_v44 = vld [vmem:[#allocation5 + $0x1a8] sm:$0xf] }
  0x6f   :  { %1486 = vmatpush.bf16.msra.mxu3 %v3672_v16  ;;  %v3477_v61 = vld [vmem:[#allocation5 + $0x310] sm:$0xf0]  ;;  %v3352_v7 = vor.u32 %v4581_v56, %v3349_v57  ;;  %v4572_v45 = vld [vmem:[#allocation5 + $0x1b4] sm:$0xf0]  ;;  %v3163_v47 = vld [vmem:[#allocation5 + $0x88] sm:$0xf] }
  0x70   :  { %1499 = vmatpush.bf16.msrb.mxu2 %v3816_v10  ;;  %v3605_v63 = vld [vmem:[#allocation5 + $0x410] sm:$0xf0]  ;;  %v3480_v9 = vor.u32 %v4613_v58, %v3477_v61  ;;  %v4677_v10 = vld [vmem:[#allocation5 + $0x504] sm:$0xf]  ;;  %v3419_v51 = vld [vmem:[#allocation5 + $0x288] sm:$0xf] }
  0x71   :  { %1459 = vmatpush.bf16.msra.mxu0 %v3400_v23  ;;  %v3861_v4 = vld [vmem:[#allocation5 + $0x610] sm:$0xf0]  ;;  %v3608_v12 = vor.u32 %v4645_v62, %v3605_v63  ;;  %v3596_v23 = vor.u32 %v4644_v15, %v3595_v14  ;;  %v3547_v56 = vld [vmem:[#allocation5 + $0x388] sm:$0xf]  ;;  %v4632_v57 = vld [vmem:[#allocation5 + $0x394] sm:$0xf0] }
  0x72   :  { %1473 = vmatpush.bf16.msra.mxu1 %v3528_v24  ;;  %v3733_v11 = vld [vmem:[#allocation5 + $0x510] sm:$0xf0]  ;;  %v3864_v16 = vor.u32 %v4709_v2, %v3861_v4  ;;  %v3451_v24 = vld [vmem:[#allocation5 + $0x2c8] sm:$0xf]  ;;  %v4568_v61 = vld [vmem:[#allocation5 + $0x194] sm:$0xf0]  ;;  %v3548_v1 = vor.u32 %v4632_v57, %v3547_v56 }
  0x73   :  { %1487 = vmatpush.bf16.msra.mxu3 %v3656_v28  ;;  %v3736_v20 = vor.u32 %v4677_v10, %v3733_v11  ;;  %v4640_v28 = vld [vmem:[#allocation5 + $0x3d4] sm:$0xf0]  ;;  %v3452_v32 = vor.u32 %v4608_v25, %v3451_v24  ;;  %v3147_v63 = vld [vmem:[#allocation5 + $0x68] sm:$0xf]  ;;  %v4546_v56 = vld [vmem:[#allocation5 + $0xec] sm:$0xf] }
  0x74   :  { %1500 = vmatpush.bf16.msrb.mxu2 %v3800_v22  ;;  %v4544_v22 = vld [vmem:[#allocation5 + $0xd4] sm:$0xf0]  ;;  %v3403_v2 = vld [vmem:[#allocation5 + $0x268] sm:$0xf]  ;;  %v3213_v57 = vld [vmem:[#allocation5 + $0xf8] sm:$0xf0] }
  0x75   :  { %1460 = vmatpush.bf16.msra.mxu0 %v3384_v35  ;;  %v3196_v29 = vor.u32 %v4544_v22, %v3195_v21  ;;  %v3580_v35 = vor.u32 %v4640_v28, %v3579_v27  ;;  %v4532_v0 = vld [vmem:[#allocation5 + $0x74] sm:$0xf0]  ;;  %v3531_v5 = vld [vmem:[#allocation5 + $0x368] sm:$0xf] }
  0x76   :  { %1474 = vmatpush.bf16.msra.mxu1 %v3512_v36  ;;  %v3435_v36 = vld [vmem:[#allocation5 + $0x2a8] sm:$0xf]  ;;  %v4628_v6 = vld [vmem:[#allocation5 + $0x374] sm:$0xf0] }
  0x77   :  { %1488 = vmatpush.bf16.msra.mxu3 %v3640_v41  ;;  %v4636_v41 = vld [vmem:[#allocation5 + $0x3b4] sm:$0xf0]  ;;  %v3436_v46 = vor.u32 %v4604_v38, %v3435_v36  ;;  %v3532_v14 = vor.u32 %v4628_v6, %v3531_v5  ;;  %v3387_v15 = vld [vmem:[#allocation5 + $0x248] sm:$0xf]  ;;  %v3216_v6 = vor.u32 %v4546_v56, %v3213_v57 }
  0x78   :  { %1501 = vmatpush.bf16.msrb.mxu2 %v3784_v34  ;;  %v4540_v34 = vld [vmem:[#allocation5 + $0xb4] sm:$0xf0]  ;;  %v3564_v49 = vor.u32 %v4636_v41, %v3563_v40  ;;  %v3515_v18 = vld [vmem:[#allocation5 + $0x348] sm:$0xf] }
  0x79   :  { %1461 = vmatpush.bf16.msra.mxu0 %v3368_v52  ;;  %v3180_v43 = vor.u32 %v4540_v34, %v3179_v33  ;;  %v4600_v52 = vld [vmem:[#allocation5 + $0x294] sm:$0xf0]  ;;  %v3259_v21 = vld [vmem:[#allocation5 + $0x148] sm:$0xf] }
  0x7a   :  { %1475 = vmatpush.bf16.msra.mxu1 %v3496_v53  ;;  %v3308_v53 = vor.u32 %v4572_v45, %v3307_v44  ;;  %v3420_v62 = vor.u32 %v4600_v52, %v3419_v51  ;;  %v4564_v10 = vld [vmem:[#allocation5 + $0x174] sm:$0xf0]  ;;  %v3115_v24 = vld [vmem:[#allocation5 + $0x28] sm:$0xf] }
  0x7b   :  { %1489 = vmatpush.bf16.msra.mxu3 %v3624_v59  ;;  %v3291_v59 = vld [vmem:[#allocation5 + $0x188] sm:$0xf]  ;;  %v4560_v22 = vld [vmem:[#allocation5 + $0x154] sm:$0xf0] }
  0x7c   :  { %1502 = vmatpush.bf16.msrb.mxu2 %v3768_v48  ;;  %v4536_v48 = vld [vmem:[#allocation5 + $0x94] sm:$0xf0]  ;;  %v3292_v4 = vor.u32 %v4568_v61, %v3291_v59  ;;  %v3371_v27 = vld [vmem:[#allocation5 + $0x228] sm:$0xf] }
  0x7d   :  { %1462 = vmatpush.bf16.msra.mxu0 %v3352_v7  ;;  %v3164_v58 = vor.u32 %v4536_v48, %v3163_v47  ;;  %v3148_v7 = vor.u32 %v4532_v0, %v3147_v63  ;;  %v4524_v25 = vld [vmem:[#allocation5 + $0x34] sm:$0xf0]  ;;  %v3499_v30 = vld [vmem:[#allocation5 + $0x328] sm:$0xf] }
  0x7e   :  { %1476 = vmatpush.bf16.msra.mxu1 %v3480_v9  ;;  %v3275_v9 = vld [vmem:[#allocation5 + $0x168] sm:$0xf]  ;;  %v4588_v28 = vld [vmem:[#allocation5 + $0x234] sm:$0xf0] }
  0x7f   :  { %1490 = vmatpush.bf16.msra.mxu3 %v3608_v12  ;;  %v3131_v12 = vld [vmem:[#allocation5 + $0x48] sm:$0xf]  ;;  %v3276_v17 = vor.u32 %v4564_v10, %v3275_v9  ;;  %v4620_v31 = vld [vmem:[#allocation5 + $0x334] sm:$0xf0]  ;;  %v3372_v36 = vor.u32 %v4588_v28, %v3371_v27  ;;  %v4542_v9 = vld [vmem:[#allocation5 + $0xcc] sm:$0xf] }
  0x80   :  { %1503 = vmatpush.bf16.msrb.mxu2 %v3752_v3  ;;  %1463 = vmatmul.bf16.vlgmr.msra.gmra.mxu0 %v5144_v54  ;;  %v4596_v3 = vld [vmem:[#allocation5 + $0x274] sm:$0xf0]  ;;  %v3243_v33 = vld [vmem:[#allocation5 + $0x128] sm:$0xf]  ;;  %v3500_v41 = vor.u32 %v4620_v31, %v3499_v30  ;;  %v3197_v10 = vld [vmem:[#allocation5 + $0xd8] sm:$0xf0] }
  0x81   :  { %1553 = vmatpush.bf16.msrb.mxu0 %v3468_v19  ;;  %1477 = vmatmul.bf16.vlgmr.msra.gmra.mxu1 %v5148_v60  ;;  %v3404_v11 = vor.u32 %v4596_v3, %v3403_v2  ;;  %v4624_v19 = vld [vmem:[#allocation5 + $0x354] sm:$0xf0]  ;;  %v3355_v44 = vld [vmem:[#allocation5 + $0x208] sm:$0xf]  ;;  %v4578_v3 = vld [vmem:[#allocation5 + $0x1ec] sm:$0xf] }
  0x82   :  { %1525 = vmatpush.bf16.msrb.mxu1 %v3212_v13  ;;  %1491 = vmatmul.bf16.vlgmr.msra.gmra.mxu3 %v5160_v37  ;;  %v4528_v13 = vld [vmem:[#allocation5 + $0x54] sm:$0xf0]  ;;  %v3851_v61 = vld [vmem:[#allocation5 + $0x5e8] sm:$0xf]  ;;  %v3309_v30 = vld [vmem:[#allocation5 + $0x1b8] sm:$0xf0] }
  0x83   :  { %1518 = vmatpush.bf16.msrb.mxu3 %v3864_v16  ;;  %v4592_v16 = vld [vmem:[#allocation5 + $0x254] sm:$0xf0]  ;;  %v3707_v63 = vld [vmem:[#allocation5 + $0x4c8] sm:$0xf] }
  0x84   :  { %1504 = vmatpush.bf16.msrb.mxu2 %v3736_v20  ;;  %v3132_v20 = vor.u32 %v4528_v13, %v3131_v12  ;;  %v4556_v34 = vld [vmem:[#allocation5 + $0x134] sm:$0xf0]  ;;  %v3835_v13 = vld [vmem:[#allocation5 + $0x5c8] sm:$0xf] }
  0x85   :  { %1554 = vmatpush.bf16.msrb.mxu0 %v3452_v32  ;;  %v3116_v32 = vor.u32 %v4524_v25, %v3115_v24  ;;  %v4520_v38 = vld [vmem:[#allocation5 + $0x14] sm:$0xf0]  ;;  %v3244_v47 = vor.u32 %v4556_v34, %v3243_v33  ;;  %v3819_v25 = vld [vmem:[#allocation5 + $0x5a8] sm:$0xf]  ;;  %v4534_v33 = vld [vmem:[#allocation5 + $0x8c] sm:$0xf] }
  0x86   :  { %1526 = vmatpush.bf16.msrb.mxu1 %v3196_v29  ;;  %v3260_v29 = vor.u32 %v4560_v22, %v3259_v21  ;;  %v4676_v40 = vld [vmem:[#allocation5 + $0x4f4] sm:$0xf0]  ;;  %v4538_v21 = vld [vmem:[#allocation5 + $0xac] sm:$0xf]  ;;  %v3181_v22 = vld [vmem:[#allocation5 + $0xb8] sm:$0xf0] }
  0x87   :  { %1539 = vmatpush.bf16.msra.mxu3 %v3340_v26  ;;  %1505 = vmatmul.bf16.vlgmr.msrb.gmra.mxu2 %v5162_v42  ;;  %v3516_v26 = vor.u32 %v4624_v19, %v3515_v18  ;;  %v4584_v45 = vld [vmem:[#allocation5 + $0x214] sm:$0xf0]  ;;  %v3325_v18 = vld [vmem:[#allocation5 + $0x1d8] sm:$0xf0]  ;;  %v3200_v19 = vor.u32 %v4542_v9, %v3197_v10  ;;  %v3675_v27 = vld [vmem:[#allocation5 + $0x488] sm:$0xf]  ;;  %v3184_v31 = vor.u32 %v4538_v21, %v3181_v22 }
  0x88   :  { %1567 = vmatpush.bf16.msra.mxu2 %v3596_v23  ;;  %v3388_v23 = vor.u32 %v4592_v16, %v3387_v15  ;;  %v4616_v48 = vld [vmem:[#allocation5 + $0x314] sm:$0xf0]  ;;  %v3356_v59 = vor.u32 %v4584_v45, %v3355_v44  ;;  %v3691_v15 = vld [vmem:[#allocation5 + $0x4a8] sm:$0xf]  ;;  %v3165_v34 = vld [vmem:[#allocation5 + $0x98] sm:$0xf0] }
  0x89   :  { %1555 = vmatpush.bf16.msrb.mxu0 %v3436_v46  ;;  %v3483_v46 = vld [vmem:[#allocation5 + $0x308] sm:$0xf]  ;;  %v4712_v51 = vld [vmem:[#allocation5 + $0x614] sm:$0xf0]  ;;  %v3293_v44 = vld [vmem:[#allocation5 + $0x198] sm:$0xf0]  ;;  %v3168_v45 = vor.u32 %v4534_v33, %v3165_v34 }
  0x8a   :  { %1527 = vmatpush.bf16.msrb.mxu1 %v3180_v43  ;;  %v3227_v43 = vld [vmem:[#allocation5 + $0x108] sm:$0xf]  ;;  %v3484_v0 = vor.u32 %v4616_v48, %v3483_v46  ;;  %v4668_v16 = vld [vmem:[#allocation5 + $0x4b4] sm:$0xf0]  ;;  %v3149_v48 = vld [vmem:[#allocation5 + $0x78] sm:$0xf0] }
  0x8b   :  { %1540 = vmatpush.bf16.msra.mxu3 %v3324_v39  ;;  %v3723_v39 = vld [vmem:[#allocation5 + $0x4e8] sm:$0xf]  ;;  %v4664_v28 = vld [vmem:[#allocation5 + $0x494] sm:$0xf0]  ;;  %v3261_v9 = vld [vmem:[#allocation5 + $0x158] sm:$0xf0] }
  0x8c   :  { %1568 = vmatpush.bf16.msra.mxu2 %v3580_v35  ;;  %v3099_v35 = vld [vmem:[#allocation5 + $0x8] sm:$0xf]  ;;  %v4656_v57 = vld [vmem:[#allocation5 + $0x454] sm:$0xf0]  ;;  %v3245_v21 = vld [vmem:[#allocation5 + $0x138] sm:$0xf0] }
  0x8d   :  { %1556 = vmatpush.bf16.msrb.mxu0 %v3420_v62  ;;  %v3100_v52 = vor.u32 %v4520_v38, %v3099_v35  ;;  %v4708_v62 = vld [vmem:[#allocation5 + $0x5f4] sm:$0xf0]  ;;  %v3676_v35 = vor.u32 %v4664_v28, %v3675_v27  ;;  %v3803_v38 = vld [vmem:[#allocation5 + $0x588] sm:$0xf]  ;;  %v4518_v27 = vld [vmem:[#allocation5 + $0xc] sm:$0xf] }
  0x8e   :  { %1528 = vmatpush.bf16.msrb.mxu1 %v3164_v58  ;;  %v3724_v58 = vor.u32 %v4676_v40, %v3723_v39  ;;  %v4696_v39 = vld [vmem:[#allocation5 + $0x594] sm:$0xf0]  ;;  %v3659_v40 = vld [vmem:[#allocation5 + $0x468] sm:$0xf]  ;;  %v3101_v28 = vld [vmem:[#allocation5 + $0x18] sm:$0xf0] }
  0x8f   :  { %1541 = vmatpush.bf16.msra.mxu3 %v3308_v53  ;;  %v4552_v53 = vld [vmem:[#allocation5 + $0x114] sm:$0xf0]  ;;  %v3804_v46 = vor.u32 %v4696_v39, %v3803_v38  ;;  %v3643_v56 = vld [vmem:[#allocation5 + $0x448] sm:$0xf]  ;;  %v3597_v33 = vld [vmem:[#allocation5 + $0x3f8] sm:$0xf0]  ;;  %v3104_v39 = vor.u32 %v4518_v27, %v3101_v28 }
  0x90   :  { %1569 = vmatpush.bf16.msra.mxu2 %v3564_v49  ;;  %v3867_v49 = vld [vmem:[#allocation5 + $0x608] sm:$0xf]  ;;  %v3228_v5 = vor.u32 %v4552_v53, %v3227_v43  ;;  %v4566_v43 = vld [vmem:[#allocation5 + $0x18c] sm:$0xf]  ;;  %v4692_v53 = vld [vmem:[#allocation5 + $0x574] sm:$0xf0] }
  0x91   :  { %1557 = vmatpush.bf16.msrb.mxu0 %v3404_v11  ;;  %v3868_v2 = vor.u32 %v4712_v51, %v3867_v49  ;;  %v3296_v51 = vor.u32 %v4566_v43, %v3293_v44  ;;  %v4606_v38 = vld [vmem:[#allocation5 + $0x2cc] sm:$0xf]  ;;  %v3229_v43 = vld [vmem:[#allocation5 + $0x118] sm:$0xf0] }
  0x92   :  { %1529 = vmatpush.bf16.msrb.mxu1 %v3148_v7  ;;  %3874 = vmatmul.msk.bf16.vlgmr.msrb.gmra.mxu3 %vm1325_vm0, %v5156_v50  ;;  %v3852_v7 = vor.u32 %v4708_v62, %v3851_v61  ;;  %v3533_v28 = vld [vmem:[#allocation5 + $0x378] sm:$0xf0] }
  0x93   :  { %1542 = vmatpush.bf16.msra.mxu3 %v3292_v4  ;;  %v3341_v4 = vld [vmem:[#allocation5 + $0x1f8] sm:$0xf0] }
  0x94   :  { %1570 = vmatpush.bf16.msra.mxu2 %v3548_v1  ;;  %v4672_v1 = vld [vmem:[#allocation5 + $0x4d4] sm:$0xf0]  ;;  %v3344_v12 = vor.u32 %v4578_v3, %v3341_v4  ;;  %v3771_v3 = vld [vmem:[#allocation5 + $0x548] sm:$0xf] }
  0x95   :  { %1558 = vmatpush.bf16.msrb.mxu0 %v3388_v23  ;;  %v3708_v11 = vor.u32 %v4672_v1, %v3707_v63  ;;  %v3692_v23 = vor.u32 %v4668_v16, %v3691_v15  ;;  %v4526_v63 = vld [vmem:[#allocation5 + $0x4c] sm:$0xf]  ;;  %v3644_v1 = vor.u32 %v4656_v57, %v3643_v56  ;;  %v4688_v4 = vld [vmem:[#allocation5 + $0x554] sm:$0xf0]  ;;  %v3755_v16 = vld [vmem:[#allocation5 + $0x528] sm:$0xf] }
  0x96   :  { %1530 = vmatpush.bf16.msrb.mxu1 %v3132_v20  ;;  %v4670_v56 = vld [vmem:[#allocation5 + $0x4cc] sm:$0xf]  ;;  %v3709_v57 = vld [vmem:[#allocation5 + $0x4d8] sm:$0xf0] }
  0x97   :  { %1543 = vmatpush.bf16.msra.mxu3 %v3276_v17  ;;  %v4574_v17 = vld [vmem:[#allocation5 + $0x1cc] sm:$0xf] }
  0x98   :  { %1571 = vmatpush.bf16.msra.mxu2 %v3532_v14  ;;  %v4704_v14 = vld [vmem:[#allocation5 + $0x5d4] sm:$0xf0]  ;;  %v3328_v24 = vor.u32 %v4574_v17, %v3325_v18  ;;  %v3611_v18 = vld [vmem:[#allocation5 + $0x408] sm:$0xf] }
  0x99   :  { %1559 = vmatpush.bf16.msrb.mxu0 %v3372_v36  ;;  %v3836_v20 = vor.u32 %v4704_v14, %v3835_v13  ;;  %v3117_v13 = vld [vmem:[#allocation5 + $0x38] sm:$0xf0]  ;;  %v4684_v17 = vld [vmem:[#allocation5 + $0x534] sm:$0xf0] }
  0x9a   :  { %1531 = vmatpush.bf16.msrb.mxu1 %v3116_v32 }
  0x9b   :  { %1544 = vmatpush.bf16.msra.mxu3 %v3260_v29  ;;  %v4570_v29 = vld [vmem:[#allocation5 + $0x1ac] sm:$0xf] }
  0x9c   :  { %1572 = vmatpush.bf16.msra.mxu2 %v3516_v26  ;;  %v4700_v26 = vld [vmem:[#allocation5 + $0x5b4] sm:$0xf0]  ;;  %v3312_v36 = vor.u32 %v4570_v29, %v3309_v30 }
  0x9d   :  { %1560 = vmatpush.bf16.msrb.mxu0 %v3356_v59  ;;  %v3820_v32 = vor.u32 %v4700_v26, %v3819_v25  ;;  %v3277_v59 = vld [vmem:[#allocation5 + $0x178] sm:$0xf0]  ;;  %v3756_v25 = vor.u32 %v4684_v17, %v3755_v16  ;;  %v3739_v26 = vld [vmem:[#allocation5 + $0x508] sm:$0xf] }
  0x9e   :  { %1532 = vmatpush.bf16.msrb.mxu1 %v3100_v52  ;;  %v3787_v52 = vld [vmem:[#allocation5 + $0x568] sm:$0xf]  ;;  %v3549_v17 = vld [vmem:[#allocation5 + $0x398] sm:$0xf0] }
  0x9f   :  { %1545 = vmatpush.bf16.msra.mxu3 %v3244_v47  ;;  %v4530_v47 = vld [vmem:[#allocation5 + $0x6c] sm:$0xf]  ;;  %v3788_v62 = vor.u32 %v4692_v53, %v3787_v52  ;;  %v3581_v53 = vld [vmem:[#allocation5 + $0x3d8] sm:$0xf0] }
  0xa0   :  { %1573 = vmatpush.bf16.msra.mxu2 %v3500_v41  ;;  %1561 = vmatmul.bf16.vlgmr.msrb.gmra.mxu0 %v5144_v54  ;;  %v4660_v41 = vld [vmem:[#allocation5 + $0x474] sm:$0xf0]  ;;  %v3152_v61 = vor.u32 %v4530_v47, %v3149_v48 }
  0xa1   :  { %1616 = vmatpush.bf16.msra.mxu0 %v3868_v2  ;;  %1533 = vmatmul.bf16.vlgmr.msrb.gmra.mxu1 %v5146_v55  ;;  %v3660_v49 = vor.u32 %v4660_v41, %v3659_v40  ;;  %v3453_v40 = vld [vmem:[#allocation5 + $0x2d8] sm:$0xf0]  ;;  %v4550_v41 = vld [vmem:[#allocation5 + $0x10c] sm:$0xf] }
  0xa2   :  { %1581 = vmatpush.bf16.msra.mxu1 %v3724_v58  ;;  %v4562_v58 = vld [vmem:[#allocation5 + $0x16c] sm:$0xf]  ;;  %v3232_v52 = vor.u32 %v4550_v41, %v3229_v43  ;;  %v3645_v43 = vld [vmem:[#allocation5 + $0x458] sm:$0xf0] }
  0xa3   :  { %1546 = vmatpush.bf16.msra.mxu3 %v3228_v5  ;;  %v3280_v2 = vor.u32 %v4562_v58, %v3277_v59  ;;  %v3627_v5 = vld [vmem:[#allocation5 + $0x428] sm:$0xf]  ;;  %v4602_v59 = vld [vmem:[#allocation5 + $0x2ac] sm:$0xf] }
  0xa4   :  { %1574 = vmatpush.bf16.msra.mxu2 %v3484_v0  ;;  %v3133_v0 = vld [vmem:[#allocation5 + $0x58] sm:$0xf0]  ;;  %v4654_v41 = vld [vmem:[#allocation5 + $0x44c] sm:$0xf] }
  0xa5   :  { %1637 = vmatpush.bf16.msrb.mxu0 %v3344_v12  ;;  %v3136_v10 = vor.u32 %v4526_v63, %v3133_v0  ;;  %v4522_v12 = vld [vmem:[#allocation5 + $0x2c] sm:$0xf]  ;;  %v3837_v63 = vld [vmem:[#allocation5 + $0x5d8] sm:$0xf0] }
  0xa6   :  { %1582 = vmatpush.bf16.msra.mxu1 %v3708_v11  ;;  %1547 = vmatmul.bf16.vlgmr.msra.gmra.mxu3 %v5152_v8  ;;  %v3772_v11 = vor.u32 %v4688_v4, %v3771_v3  ;;  %v3120_v22 = vor.u32 %v4522_v12, %v3117_v13  ;;  %v3565_v4 = vld [vmem:[#allocation5 + $0x3b8] sm:$0xf0] }
  0xa7   :  { %1595 = vmatpush.bf16.msrb.mxu3 %v3852_v7  ;;  %1575 = vmatmul.bf16.vlgmr.msra.gmra.mxu2 %v5148_v60  ;;  %v4558_v7 = vld [vmem:[#allocation5 + $0x14c] sm:$0xf]  ;;  %v3821_v12 = vld [vmem:[#allocation5 + $0x5b8] sm:$0xf0] }
  0xa8   :  { %1623 = vmatpush.bf16.msrb.mxu2 %v3216_v6  ;;  %v4652_v6 = vld [vmem:[#allocation5 + $0x434] sm:$0xf0]  ;;  %v3264_v15 = vor.u32 %v4558_v7, %v3261_v9  ;;  %v4598_v9 = vld [vmem:[#allocation5 + $0x28c] sm:$0xf] }
  0xa9   :  { %1638 = vmatpush.bf16.msrb.mxu0 %v3328_v24  ;;  %v3628_v14 = vor.u32 %v4652_v6, %v3627_v5  ;;  %v3469_v24 = vld [vmem:[#allocation5 + $0x2f8] sm:$0xf0]  ;;  %v4666_v5 = vld [vmem:[#allocation5 + $0x4ac] sm:$0xf] }
  0xaa   :  { %1583 = vmatpush.bf16.msra.mxu1 %v3692_v23  ;;  %v4610_v23 = vld [vmem:[#allocation5 + $0x2ec] sm:$0xf]  ;;  %v3693_v6 = vld [vmem:[#allocation5 + $0x4b8] sm:$0xf0] }
  0xab   :  { %1596 = vmatpush.bf16.msrb.mxu3 %v3836_v20  ;;  %v4554_v20 = vld [vmem:[#allocation5 + $0x12c] sm:$0xf]  ;;  %v3472_v34 = vor.u32 %v4610_v23, %v3469_v24 }
  0xac   :  { %1624 = vmatpush.bf16.msrb.mxu2 %v3200_v19  ;;  %v4648_v19 = vld [vmem:[#allocation5 + $0x414] sm:$0xf0]  ;;  %v3248_v30 = vor.u32 %v4554_v20, %v3245_v21  ;;  %v4594_v21 = vld [vmem:[#allocation5 + $0x26c] sm:$0xf] }
  0xad   :  { %1639 = vmatpush.bf16.msrb.mxu0 %v3312_v36  ;;  %v3612_v29 = vor.u32 %v4648_v19, %v3611_v18  ;;  %v3725_v36 = vld [vmem:[#allocation5 + $0x4f8] sm:$0xf0]  ;;  %v4662_v18 = vld [vmem:[#allocation5 + $0x48c] sm:$0xf] }
  0xae   :  { %1584 = vmatpush.bf16.msra.mxu1 %v3676_v35  ;;  %v4674_v35 = vld [vmem:[#allocation5 + $0x4ec] sm:$0xf]  ;;  %v3677_v19 = vld [vmem:[#allocation5 + $0x498] sm:$0xf0] }
  0xaf   :  { %1597 = vmatpush.bf16.msrb.mxu3 %v3820_v32  ;;  %v4642_v32 = vld [vmem:[#allocation5 + $0x3ec] sm:$0xf]  ;;  %v3728_v48 = vor.u32 %v4674_v35, %v3725_v36 }
  0xb0   :  { %1625 = vmatpush.bf16.msrb.mxu2 %v3184_v31  ;;  %3875 = vmatmul.msk.bf16.vlgmr.msra.gmra.mxu0 %vm1325_vm0, %v5156_v50  ;;  %v4680_v31 = vld [vmem:[#allocation5 + $0x514] sm:$0xf0]  ;;  %v3600_v47 = vor.u32 %v4642_v32, %v3597_v33  ;;  %v4694_v23 = vld [vmem:[#allocation5 + $0x58c] sm:$0xf] }
  0xb1   :  { %1640 = vmatpush.bf16.msrb.mxu0 %v3296_v51  ;;  %v3740_v44 = vor.u32 %v4680_v31, %v3739_v26  ;;  %v3456_v51 = vor.u32 %v4606_v38, %v3453_v40  ;;  %v4626_v26 = vld [vmem:[#allocation5 + $0x36c] sm:$0xf]  ;;  %v3517_v40 = vld [vmem:[#allocation5 + $0x358] sm:$0xf0] }
  0xb2   :  { %1585 = vmatpush.bf16.msra.mxu1 %v3660_v49  ;;  %v4638_v49 = vld [vmem:[#allocation5 + $0x3cc] sm:$0xf]  ;;  %v3536_v35 = vor.u32 %v4626_v26, %v3533_v28  ;;  %v4739_v28 = vld [vmem:[#allocation8 + $0xcc] sm:$0xf0] }
  0xb3   :  { %1598 = vmatpush.bf16.msrb.mxu3 %v3804_v46  ;;  %v3853_v46 = vld [vmem:[#allocation5 + $0x5f8] sm:$0xf0]  ;;  %v3584_v0 = vor.u32 %v4638_v49, %v3581_v53  ;;  %v4590_v32 = vld [vmem:[#allocation5 + $0x24c] sm:$0xf] }
  0xb4   :  { %1626 = vmatpush.bf16.msrb.mxu2 %v3168_v45  ;;  %v4706_v45 = vld [vmem:[#allocation5 + $0x5ec] sm:$0xf] }
  0xb5   :  { %1641 = vmatpush.bf16.msrb.mxu0 %v3280_v2  ;;  %v3856_v58 = vor.u32 %v4706_v45, %v3853_v46  ;;  %v4634_v2 = vld [vmem:[#allocation5 + $0x3ac] sm:$0xf]  ;;  %v3373_v46 = vld [vmem:[#allocation5 + $0x238] sm:$0xf0] }
  0xb6   :  { %1586 = vmatpush.bf16.msra.mxu1 %v3644_v1  ;;  %v3712_v1 = vor.u32 %v4670_v56, %v3709_v57  ;;  %v3568_v13 = vor.u32 %v4634_v2, %v3565_v4  ;;  %v4690_v33 = vld [vmem:[#allocation5 + $0x56c] sm:$0xf]  ;;  %v3501_v57 = vld [vmem:[#allocation5 + $0x338] sm:$0xf0] }
  0xb7   :  { %1599 = vmatpush.bf16.msrb.mxu3 %v3788_v62  ;;  %v4702_v62 = vld [vmem:[#allocation5 + $0x5cc] sm:$0xf]  ;;  %v3757_v2 = vld [vmem:[#allocation5 + $0x538] sm:$0xf0] }
  0xb8   :  { %1627 = vmatpush.bf16.msrb.mxu2 %v3152_v61  ;;  %v3437_v61 = vld [vmem:[#allocation5 + $0x2b8] sm:$0xf0]  ;;  %v3840_v7 = vor.u32 %v4702_v62, %v3837_v63  ;;  %v4622_v38 = vld [vmem:[#allocation5 + $0x34c] sm:$0xf] }
  0xb9   :  { %1642 = vmatpush.bf16.msrb.mxu0 %v3264_v15  ;;  %v3440_v3 = vor.u32 %v4602_v59, %v3437_v61  ;;  %v4630_v15 = vld [vmem:[#allocation5 + $0x38c] sm:$0xf]  ;;  %v3520_v49 = vor.u32 %v4622_v38, %v3517_v40  ;;  %v3629_v59 = vld [vmem:[#allocation5 + $0x438] sm:$0xf0]  ;;  %v3959_v38 = vld [vmem:[#allocation8 + $0xa0] sm:$0xf] }
  0xba   :  { %1587 = vmatpush.bf16.msra.mxu1 %v3628_v14  ;;  %v3696_v14 = vor.u32 %v4666_v5, %v3693_v6  ;;  %v3552_v24 = vor.u32 %v4630_v15, %v3549_v17  ;;  %v4586_v45 = vld [vmem:[#allocation5 + $0x22c] sm:$0xf]  ;;  %v3869_v4 = vld [vmem:[#allocation5 + $0x618] sm:$0xf0]  ;;  %v4743_v17 = vld [vmem:[#allocation8 + $0xec] sm:$0xf0] }
  0xbb   :  { %1600 = vmatpush.bf16.msrb.mxu3 %v3772_v11  ;;  %v4698_v11 = vld [vmem:[#allocation5 + $0x5ac] sm:$0xf]  ;;  %v3376_v56 = vor.u32 %v4586_v45, %v3373_v46 }
  0xbc   :  { %1628 = vmatpush.bf16.msrb.mxu2 %v3136_v10  ;;  %v3421_v10 = vld [vmem:[#allocation5 + $0x298] sm:$0xf0]  ;;  %v3824_v20 = vor.u32 %v4698_v11, %v3821_v12  ;;  %v4582_v63 = vld [vmem:[#allocation5 + $0x20c] sm:$0xf] }
  0xbd   :  { %1643 = vmatpush.bf16.msrb.mxu0 %v3248_v30  ;;  %v3424_v16 = vor.u32 %v4598_v9, %v3421_v10  ;;  %v3661_v30 = vld [vmem:[#allocation5 + $0x478] sm:$0xf0]  ;;  %v5186_v9 = vld [vmem:[#allocation7] sm:$0xf] }
  0xbe   :  { %1588 = vmatpush.bf16.msra.mxu1 %v3612_v29  ;;  %v4658_v29 = vld [vmem:[#allocation5 + $0x46c] sm:$0xf]  ;;  %v3485_v12 = vld [vmem:[#allocation5 + $0x318] sm:$0xf0] }
  0xbf   :  { %1601 = vmatpush.bf16.msrb.mxu3 %v3756_v25  ;;  %v3680_v25 = vor.u32 %v4662_v18, %v3677_v19  ;;  %v3664_v36 = vor.u32 %v4658_v29, %v3661_v30  ;;  %v4678_v18 = vld [vmem:[#allocation5 + $0x50c] sm:$0xf] }
  0xc0   :  { %1629 = vmatpush.bf16.msrb.mxu2 %v3120_v22  ;;  %v3405_v22 = vld [vmem:[#allocation5 + $0x278] sm:$0xf0]  ;;  %v1338_v53 = vpop.f32.mrf.mxu0 }
  0xc1   :  { %1589 = vmatmul.bf16.vlgmr.msra.gmra.mxu1 %v5160_v37  ;;  %1644 = vmatpush.bf16.msrb.mxu0 %v3232_v52  ;;  %v3408_v27 = vor.u32 %v4594_v21, %v3405_v22  ;;  %v4618_v52 = vld [vmem:[#allocation5 + $0x32c] sm:$0xf]  ;;  %v4119_v21 = vld [vmem:[#allocation8 + $0x1e0] sm:$0xf]  ;;  %v4775_v22 = vld [vmem:[#allocation8 + $0x1ec] sm:$0xf0] }
  0xc2   :  { %1651 = vmatpush.bf16.msrb.mxu1 %v3472_v34  ;;  %v3789_v34 = vld [vmem:[#allocation5 + $0x578] sm:$0xf0]  ;;  %v3504_v5 = vor.u32 %v4618_v52, %v3501_v57  ;;  %v4120_v29 = vor.u32 %v4775_v22, %v4119_v21  ;;  %v4071_v52 = vld [vmem:[#allocation8 + $0x180] sm:$0xf]  ;;  %v4751_v21 = vld [vmem:[#allocation8 + $0x12c] sm:$0xf0] }
  0xc3   :  { %1602 = vmatpush.bf16.msrb.mxu3 %v3740_v44  ;;  %v3792_v44 = vor.u32 %v4690_v33, %v3789_v34 }
  0xc4   :  { %1630 = vmatpush.bf16.msrb.mxu2 %v3104_v39  ;;  %1645 = vmatmul.bf16.vlgmr.msrb.gmra.mxu0 %v5152_v8  ;;  %v3389_v8 = vld [vmem:[#allocation5 + $0x258] sm:$0xf0]  ;;  %v5184_v61 = vpop.f32.mrf.mxu1 }
  0xc5   :  { %1693 = vmatpush.bf16.msra.mxu0 %v3856_v58  ;;  %v3392_v39 = vor.u32 %v4590_v32, %v3389_v8  ;;  %v4650_v58 = vld [vmem:[#allocation5 + $0x42c] sm:$0xf]  ;;  %v5188_v10 = vpop.f32.mrf.mxu2  ;;  %v4771_v32 = vld [vmem:[#allocation8 + $0x1cc] sm:$0xf0] }
  0xc6   :  { %1652 = vmatpush.bf16.msrb.mxu1 %v3456_v51  ;;  %1603 = vmatmul.bf16.vlgmr.msrb.gmra.mxu3 %v5162_v42  ;;  %v3648_v51 = vor.u32 %v4654_v41, %v3645_v43  ;;  %v3632_v6 = vor.u32 %v4650_v58, %v3629_v59  ;;  %v4087_v43 = vld [vmem:[#allocation8 + $0x1a0] sm:$0xf]  ;;  %v4727_v59 = vld [vmem:[#allocation8 + $0x6c] sm:$0xf0] }
  0xc7   :  { %1665 = vmatpush.bf16.msra.mxu3 %v3600_v47  ;;  %1631 = vmatmul.bf16.vlgmr.msrb.gmra.mxu2 %v5146_v55  ;;  %v3805_v55 = vld [vmem:[#allocation5 + $0x598] sm:$0xf0]  ;;  %v4686_v47 = vld [vmem:[#allocation5 + $0x54c] sm:$0xf]  ;;  %v1380_v33 = vpop.f32.mrf.mxu3  ;;  %v3927_v58 = vld [vmem:[#allocation8 + $0x60] sm:$0xf] }
  0xc8   :  { %1679 = vmatpush.bf16.msra.mxu2 %v3728_v48  ;;  %v3808_v31 = vor.u32 %v4694_v23, %v3805_v55  ;;  %v3773_v48 = vld [vmem:[#allocation5 + $0x558] sm:$0xf0]  ;;  %v1340_v30 = vpop.f32.mrf.mxu0 }
  0xc9   :  { %1694 = vmatpush.bf16.msra.mxu0 %v3840_v7  ;;  %v3776_v62 = vor.u32 %v4686_v47, %v3773_v48  ;;  %v4614_v7 = vld [vmem:[#allocation5 + $0x30c] sm:$0xf]  ;;  %v3943_v47 = vld [vmem:[#allocation8 + $0x80] sm:$0xf]  ;;  %v4731_v48 = vld [vmem:[#allocation8 + $0x8c] sm:$0xf0] }
  0xca   :  { %1653 = vmatpush.bf16.msrb.mxu1 %v3440_v3  ;;  %v4710_v3 = vld [vmem:[#allocation5 + $0x60c] sm:$0xf]  ;;  %v3488_v23 = vor.u32 %v4614_v7, %v3485_v12 }
  0xcb   :  { %1666 = vmatpush.bf16.msra.mxu3 %v3584_v0  ;;  %v3357_v0 = vld [vmem:[#allocation5 + $0x218] sm:$0xf0]  ;;  %v3872_v19 = vor.u32 %v4710_v3, %v3869_v4  ;;  %v3911_v4 = vld [vmem:[#allocation8 + $0x40] sm:$0xf] }
  0xcc   :  { %1680 = vmatpush.bf16.msra.mxu2 %v3712_v1  ;;  %v4682_v1 = vld [vmem:[#allocation5 + $0x52c] sm:$0xf]  ;;  %v3360_v11 = vor.u32 %v4582_v63, %v3357_v0  ;;  %v1354_v8 = vpop.f32.mrf.mxu1  ;;  %v4055_v63 = vld [vmem:[#allocation8 + $0x160] sm:$0xf]  ;;  %v4759_v0 = vld [vmem:[#allocation8 + $0x16c] sm:$0xf0] }
  0xcd   :  { %1695 = vmatpush.bf16.msra.mxu0 %v3824_v20  ;;  %v3760_v15 = vor.u32 %v4682_v1, %v3757_v2  ;;  %v3741_v20 = vld [vmem:[#allocation5 + $0x518] sm:$0xf0]  ;;  %v1368_v41 = vpop.f32.mrf.mxu2  ;;  %v3928_v1 = vor.u32 %v4727_v59, %v3927_v58  ;;  %v4803_v58 = vld [vmem:[#allocation8 + $0x2cc] sm:$0xf0]  ;;  %v4729_v59 = vld [vmem:[#allocation8 + $0x84] sm:$0xf] }
  0xce   :  { %1654 = vmatpush.bf16.msrb.mxu1 %v3424_v16  ;;  %v3991_v16 = vld [vmem:[#allocation8 + $0xe0] sm:$0xf]  ;;  %v3744_v26 = vor.u32 %v4678_v18, %v3741_v20  ;;  %v4719_v18 = vld [vmem:[#allocation8 + $0x2c] sm:$0xf0] }
  0xcf   :  { %1667 = vmatpush.bf16.msra.mxu3 %v3568_v13  ;;  %v4646_v13 = vld [vmem:[#allocation5 + $0x40c] sm:$0xf]  ;;  %v4023_v20 = vld [vmem:[#allocation8 + $0x120] sm:$0xf] }
  0xd0   :  { %1681 = vmatpush.bf16.msra.mxu2 %v3696_v14  ;;  %v3613_v14 = vld [vmem:[#allocation5 + $0x418] sm:$0xf0] }
  0xd1   :  { %1696 = vmatpush.bf16.msra.mxu0 %v3808_v31  ;;  %v3616_v55 = vor.u32 %v4646_v13, %v3613_v14  ;;  %v4103_v31 = vld [vmem:[#allocation8 + $0x1c0] sm:$0xf] }
  0xd2   :  { %1655 = vmatpush.bf16.msrb.mxu1 %v3408_v27  ;;  %v3975_v27 = vld [vmem:[#allocation8 + $0xc0] sm:$0xf]  ;;  %v4104_v40 = vor.u32 %v4771_v32, %v4103_v31  ;;  %v4773_v32 = vld [vmem:[#allocation8 + $0x1e4] sm:$0xf] }
  0xd3   :  { %1668 = vmatpush.bf16.msra.mxu3 %v3552_v24  ;;  %v3992_v24 = vor.u32 %v4743_v17, %v3991_v16  ;;  %v3976_v34 = vor.u32 %v4739_v28, %v3975_v27  ;;  %v3895_v17 = vld [vmem:[#allocation8 + $0x20] sm:$0xf]  ;;  %v4741_v27 = vld [vmem:[#allocation8 + $0xe4] sm:$0xf]  ;;  %v3993_v28 = vld [vmem:[#allocation8 + $0xf0] sm:$0xf0] }
  0xd4   :  { %1682 = vmatpush.bf16.msra.mxu2 %v3680_v25  ;;  %v337_v25 = vperm.slane %v5186_v9, 0 }
  0xd5   :  { %1697 = vmatpush.bf16.msra.mxu0 %v3792_v44  ;;  %v4767_v44 = vld [vmem:[#allocation8 + $0x1ac] sm:$0xf0] }
  0xd6   :  { %1656 = vmatpush.bf16.msrb.mxu1 %v3392_v39  ;;  %v4735_v39 = vld [vmem:[#allocation8 + $0xac] sm:$0xf0] }
  0xd7   :  { %1669 = vmatpush.bf16.msra.mxu3 %v3536_v35  ;;  %v1339_v35 = vadd.f32 %v1338_v53, %v337_v25  ;;  %v4763_v53 = vld [vmem:[#allocation8 + $0x18c] sm:$0xf0] }
  0xd8   :  { %1683 = vmatpush.bf16.msra.mxu2 %v3664_v36  ;;  %v1341_v36 = vadd.f32 %v1340_v30, %v337_v25  ;;  %v3879_v25 = vld [vmem:[#allocation8] sm:$0xf]  ;;  %v4747_v30 = vld [vmem:[#allocation8 + $0x10c] sm:$0xf0] }
  0xd9   :  { %1698 = vmatpush.bf16.msra.mxu0 %v3776_v62  ;;  %v1353_v45 = vadd.f32 %v5184_v61, %v1339_v35  ;;  %v1382_v62 = vpop.f32.mrf.mxu3  ;;  %v1422_v61 = vpop.f32.mrf.mxu2 }
  0xda   :  { %1657 = vmatpush.bf16.msrb.mxu1 %v3376_v56  ;;  %v1355_v46 = vadd.f32 %v1354_v8, %v1341_v36  ;;  %v4121_v8 = vld [vmem:[#allocation8 + $0x1f0] sm:$0xf0]  ;;  %v3996_v36 = vor.u32 %v4741_v27, %v3993_v28  ;;  %v4183_v27 = vld [vmem:[#allocation8 + $0x260] sm:$0xf]  ;;  %v4717_v28 = vld [vmem:[#allocation8 + $0x24] sm:$0xf] }
  0xdb   :  { %1670 = vmatpush.bf16.msra.mxu3 %v3520_v49  ;;  %v4088_v49 = vor.u32 %v4767_v44, %v4087_v43  ;;  %v1367_v57 = vadd.f32 %v5188_v10, %v1353_v45  ;;  %v4755_v10 = vld [vmem:[#allocation8 + $0x14c] sm:$0xf0]  ;;  %v4769_v44 = vld [vmem:[#allocation8 + $0x1c4] sm:$0xf] }
  0xdc   :  { %1684 = vmatpush.bf16.msra.mxu2 %v3648_v51 }
  0xdd   :  { %1699 = vmatpush.bf16.msra.mxu0 %v3760_v15  ;;  %v1394_v51 = vpop.f32.mrf.mxu0  ;;  %v1381_v2 = vadd.f32 %v1380_v33, %v1367_v57 }
  0xde   :  { %1658 = vmatpush.bf16.msrb.mxu1 %v3360_v11  ;;  %v1408_v56 = vpop.f32.mrf.mxu1  ;;  %v4039_v11 = vld [vmem:[#allocation8 + $0x140] sm:$0xf] }
  0xdf   :  { %1671 = vmatpush.bf16.msra.mxu3 %v3504_v5  ;;  %v4723_v5 = vld [vmem:[#allocation8 + $0x4c] sm:$0xf0]  ;;  %v1395_v12 = vadd.f32 %v1394_v51, %v1381_v2  ;;  %v3961_v51 = vld [vmem:[#allocation8 + $0xb0] sm:$0xf0] }
  0xe0   :  { %1685 = vmatpush.bf16.msra.mxu2 %v3632_v6  ;;  %v4056_v6 = vor.u32 %v4759_v0, %v4055_v63  ;;  %v3912_v15 = vor.u32 %v4723_v5, %v3911_v4  ;;  %v4073_v2 = vld [vmem:[#allocation8 + $0x190] sm:$0xf0]  ;;  %v4215_v4 = vld [vmem:[#allocation8 + $0x2a0] sm:$0xf]  ;;  %v4799_v5 = vld [vmem:[#allocation8 + $0x2ac] sm:$0xf0] }
  0xe1   :  { %1659 = vmatmul.bf16.vlgmr.msrb.gmra.mxu1 %v5144_v54  ;;  %1700 = vmatpush.bf16.msra.mxu0 %v3744_v26  ;;  %v3960_v54 = vor.u32 %v4735_v39, %v3959_v38  ;;  %v1409_v22 = vadd.f32 %v1408_v56, %v1395_v12  ;;  %v4715_v26 = vld [vmem:[#allocation8 + $0xc] sm:$0xf0]  ;;  %v4737_v39 = vld [vmem:[#allocation8 + $0xc4] sm:$0xf] }
  0xe2   :  { %1714 = vmatpush.bf16.msra.mxu1 %v3872_v19  ;;  %v4040_v19 = vor.u32 %v4755_v10, %v4039_v11  ;;  %v3880_v33 = vor.u32 %v4715_v26, %v3879_v25  ;;  %v4765_v56 = vld [vmem:[#allocation8 + $0x1a4] sm:$0xf]  ;;  %v4216_v10 = vor.u32 %v4799_v5, %v4215_v4 }
  0xe3   :  { %1672 = vmatpush.bf16.msra.mxu3 %v3488_v23  ;;  %v1424_v23 = vpop.f32.mrf.mxu2  ;;  %v1423_v31 = vadd.f32 %v1422_v61, %v1409_v22  ;;  %v4757_v12 = vld [vmem:[#allocation8 + $0x164] sm:$0xf] }
  0xe4   :  { %1686 = vmatpush.bf16.msra.mxu2 %v3616_v55  ;;  %1701 = vmatmul.bf16.vlgmr.msra.gmra.mxu0 %v5162_v42  ;;  %v4072_v42 = vor.u32 %v4763_v53, %v4071_v52  ;;  %v3896_v55 = vor.u32 %v4719_v18, %v3895_v17  ;;  %v3913_v17 = vld [vmem:[#allocation8 + $0x50] sm:$0xf0]  ;;  %v4753_v22 = vld [vmem:[#allocation8 + $0x144] sm:$0xf] }
  0xe5   :  { %v1396_v7 = vpop.f32.mrf.mxu0  ;;  %v5199_v35 = vpop.f32.mrf.mxu3  ;;  %v1721_v43 = vmax.f32 %v1423_v31, 0.0 }
  0xe6   :  { %2525 = vmatpush.bf16.msrb.mxu1 %v4120_v29  ;;  %1673 = vmatmul.bf16.vlgmr.msra.gmra.mxu3 %v5148_v60  ;;  %v3944_v60 = vor.u32 %v4731_v48, %v3943_v47  ;;  %v1410_v14 = vpop.f32.mrf.mxu1  ;;  %v4007_v29 = vld [vmem:[#allocation8 + $0x100] sm:$0xf]  ;;  %v4807_v48 = vld [vmem:[#allocation8 + $0x2ec] sm:$0xf0] }
  0xe7   :  { %2511 = vmatpush.bf16.msrb.mxu3 %v3992_v24  ;;  %1687 = vmatmul.bf16.vlgmr.msra.gmra.mxu2 %v5160_v37  ;;  %v1369_v37 = vadd.f32 %v1368_v41, %v1355_v46  ;;  %v4008_v38 = vor.u32 %v4747_v30, %v4007_v29  ;;  %v4124_v41 = vor.u32 %v4773_v32, %v4121_v8  ;;  %v4247_v47 = vld [vmem:[#allocation8 + $0x2e0] sm:$0xf]  ;;  %v3897_v29 = vld [vmem:[#allocation8 + $0x30] sm:$0xf0]  ;;  %v4749_v8 = vld [vmem:[#allocation8 + $0x124] sm:$0xf] }
  0xe8   :  { %v4248_v53 = vor.u32 %v4807_v48, %v4247_v47  ;;  %v4744_v48 = vld [vmem:[#allocation8 + $0xf4] sm:$0xf0] }
  0xe9   :  { %v1383_v3 = vadd.f32 %v1382_v62, %v1369_v37  ;;  %v4231_v37 = vld [vmem:[#allocation8 + $0x2c0] sm:$0xf] }
  0xea   :  { %2526 = vmatpush.bf16.msrb.mxu1 %v4104_v40  ;;  %v3977_v40 = vld [vmem:[#allocation8 + $0xd0] sm:$0xf0]  ;;  %2539 = vmatpush.bf16.msrb.mxu2 %v4248_v53  ;;  %v4232_v61 = vor.u32 %v4803_v58, %v4231_v37  ;;  %v4783_v37 = vld [vmem:[#allocation8 + $0x22c] sm:$0xf0] }
  0xeb   :  { %2512 = vmatpush.bf16.msrb.mxu3 %v3976_v34  ;;  %v1397_v13 = vadd.f32 %v1396_v7, %v1383_v3  ;;  %v3980_v46 = vor.u32 %v4737_v39, %v3977_v40  ;;  %v1450_v63 = vpop.f32.mrf.mxu2  ;;  %v3929_v7 = vld [vmem:[#allocation8 + $0x70] sm:$0xf0]  ;;  %v4167_v39 = vld [vmem:[#allocation8 + $0x240] sm:$0xf]  ;;  %v4787_v40 = vld [vmem:[#allocation8 + $0x24c] sm:$0xf0] }
  0xed   :  { %v1411_v16 = vadd.f32 %v1410_v14, %v1397_v13  ;;  %v1438_v0 = vpop.f32.mrf.mxu3  ;;  %v4057_v13 = vld [vmem:[#allocation8 + $0x170] sm:$0xf0] }
  0xee   :  { %2527 = vmatpush.bf16.msrb.mxu1 %v4088_v49  ;;  %v4733_v49 = vld [vmem:[#allocation8 + $0xa4] sm:$0xf]  ;;  %2540 = vmatpush.bf16.msrb.mxu2 %v4232_v61  ;;  %v4060_v18 = vor.u32 %v4757_v12, %v4057_v13  ;;  %v3983_v61 = vld [vmem:[#allocation8 + $0xc8] sm:$0xf]  ;;  %v4736_v13 = vld [vmem:[#allocation8 + $0xb4] sm:$0xf0] }
  0xef   :  { %2513 = vmatpush.bf16.msrb.mxu3 %v3960_v54  ;;  %v1425_v24 = vadd.f32 %v1424_v23, %v1411_v16  ;;  %v4105_v54 = vld [vmem:[#allocation8 + $0x1d0] sm:$0xf0]  ;;  %v3964_v57 = vor.u32 %v4733_v49, %v3961_v51  ;;  %v4721_v16 = vld [vmem:[#allocation8 + $0x44] sm:$0xf]  ;;  %v3967_v12 = vld [vmem:[#allocation8 + $0xa8] sm:$0xf] }
  0xf0   :  { %v4108_v52 = vor.u32 %v4769_v44, %v4105_v54  ;;  %v4041_v23 = vld [vmem:[#allocation8 + $0x150] sm:$0xf0]  ;;  %v3916_v26 = vor.u32 %v4721_v16, %v3913_v17  ;;  %v3999_v44 = vld [vmem:[#allocation8 + $0xe8] sm:$0xf]  ;;  %v4745_v49 = vld [vmem:[#allocation8 + $0x104] sm:$0xf] }
  0xf1   :  { %3876 = vmatmul.msk.bf16.vlgmr.msra.gmra.mxu1 %vm1325_vm0, %v5156_v50  ;;  %v4024_v50 = vor.u32 %v4751_v21, %v4023_v20  ;;  %v1725_v34 = vmax.f32 %v1425_v24, 0.0  ;;  %v338_v24 = vperm.slane %v5186_v9, 1  ;;  %v4044_v30 = vor.u32 %v4753_v22, %v4041_v23  ;;  %v4009_v51 = vld [vmem:[#allocation8 + $0x110] sm:$0xf0] }
  0xf2   :  { %2528 = vmatpush.bf16.msrb.mxu1 %v4072_v42  ;;  %v3945_v42 = vld [vmem:[#allocation8 + $0x90] sm:$0xf0]  ;;  %2541 = vmatpush.bf16.msrb.mxu2 %v4216_v10 }
  0xf3   :  { %2514 = vmatpush.bf16.msrb.mxu3 %v3944_v60  ;;  %v5201_v45 = vpack.c.bf16 %v1725_v34, %v1721_v43  ;;  %v4089_v60 = vld [vmem:[#allocation8 + $0x1b0] sm:$0xf0]  ;;  %v3948_v3 = vor.u32 %v4729_v59, %v3945_v42  ;;  %v1452_v25 = vpop.f32.mrf.mxu2  ;;  %v1437_v34 = vadd.f32 %v5199_v35, %v338_v24  ;;  %v4000_v59 = vor.u32 %v4744_v48, %v3999_v44  ;;  %v3919_v44 = vld [vmem:[#allocation8 + $0x48] sm:$0xf]  ;;  %v4724_v48 = vld [vmem:[#allocation8 + $0x54] sm:$0xf0] }
  0xf4   :  { %v4092_v62 = vor.u32 %v4765_v56, %v4089_v60  ;;  %v3881_v43 = vld [vmem:[#allocation8 + $0x10] sm:$0xf0]  ;;  %v4012_v42 = vor.u32 %v4745_v49, %v4009_v51  ;;  %v4793_v49 = vld [vmem:[#allocation8 + $0x284] sm:$0xf] }
  0xf5   :  { %v4233_v22 = vld [vmem:[#allocation8 + $0x2d0] sm:$0xf0] }
  0xf6   :  { %2529 = vmatpush.bf16.msrb.mxu1 %v4056_v6  ;;  %v4725_v6 = vld [vmem:[#allocation8 + $0x64] sm:$0xf] }
  0xf7   :  { %2515 = vmatpush.bf16.msrb.mxu3 %v3928_v1  ;;  %v4761_v1 = vld [vmem:[#allocation8 + $0x184] sm:$0xf]  ;;  %v3932_v14 = vor.u32 %v4725_v6, %v3929_v7 }
  0xf8   :  { %v4076_v11 = vor.u32 %v4761_v1, %v4073_v2  ;;  %v4805_v7 = vld [vmem:[#allocation8 + $0x2e4] sm:$0xf] }
  0xfa   :  { %2530 = vmatpush.bf16.msrb.mxu1 %v4040_v19  ;;  %v4795_v19 = vld [vmem:[#allocation8 + $0x28c] sm:$0xf0] }
  0xfb   :  { %2516 = vmatpush.bf16.msrb.mxu3 %v3912_v15  ;;  %v4199_v15 = vld [vmem:[#allocation8 + $0x280] sm:$0xf] }
  0xfd   :  { %v1464_v20 = vpop.f32.mrf.mxu0 }
  0xfe   :  { %2531 = vmatpush.bf16.msrb.mxu1 %v4024_v50  ;;  %v4791_v50 = vld [vmem:[#allocation8 + $0x26c] sm:$0xf0]  ;;  %v1478_v32 = vpop.f32.mrf.mxu1 }
  0xff   :  { %2517 = vmatpush.bf16.msrb.mxu3 %v3896_v55  ;;  %v4200_v55 = vor.u32 %v4795_v19, %v4199_v15  ;;  %v4184_v31 = vor.u32 %v4791_v50, %v4183_v27  ;;  %v3951_v19 = vld [vmem:[#allocation8 + $0x88] sm:$0xf] }
 0x101   :  { %2542 = vmatpush.bf16.msrb.mxu2 %v4200_v55  ;;  %v4732_v55 = vld [vmem:[#allocation8 + $0x94] sm:$0xf0] }
 0x102   :  { %2532 = vmatpush.bf16.msrb.mxu1 %v4008_v38  ;;  %v3900_v38 = vor.u32 %v4717_v28, %v3897_v29  ;;  %v3952_v29 = vor.u32 %v4732_v55, %v3951_v19  ;;  %v4823_v19 = vld [vmem:[#allocation8 + $0x36c] sm:$0xf0]  ;;  %v4001_v55 = vld [vmem:[#allocation8 + $0xf8] sm:$0xf0] }
 0x103   :  { %2518 = vmatpush.bf16.msrb.mxu3 %v3880_v33  ;;  %v4025_v33 = vld [vmem:[#allocation8 + $0x130] sm:$0xf0] }
 0x104   :  { %v4028_v54 = vor.u32 %v4749_v8, %v4025_v33  ;;  %v4728_v33 = vld [vmem:[#allocation8 + $0x74] sm:$0xf0] }
 0x105   :  { %v5204_v21 = vpop.f32.mrf.mxu3  ;;  %2543 = vmatpush.bf16.msrb.mxu2 %v4184_v31  ;;  %v1466_v56 = vpop.f32.mrf.mxu0  ;;  %v4797_v31 = vld [vmem:[#allocation8 + $0x2a4] sm:$0xf] }
 0x106   :  { %2581 = vmatpush.bf16.msra.mxu1 %v4124_v41  ;;  %2519 = vmatmul.bf16.vlgmr.msrb.gmra.mxu3 %v5201_v45  ;;  %v4713_v41 = vld [vmem:[#allocation8 + $0x4] sm:$0xf]  ;;  %v1480_v2 = vpop.f32.mrf.mxu1 }
 0x107   :  { %2567 = vmatpush.bf16.msra.mxu3 %v3996_v36  ;;  %v1439_v36 = vadd.f32 %v1438_v0, %v338_v24  ;;  %v3884_v60 = vor.u32 %v4713_v41, %v3881_v43  ;;  %v4740_v0 = vld [vmem:[#allocation8 + $0xd4] sm:$0xf0] }
 0x108   :  { %v3984_v5 = vor.u32 %v4740_v0, %v3983_v61  ;;  %v4776_v41 = vld [vmem:[#allocation8 + $0x1f4] sm:$0xf0]  ;;  %v4185_v61 = vld [vmem:[#allocation8 + $0x270] sm:$0xf0] }
 0x109   :  { %v1453_v53 = vadd.f32 %v1452_v25, %v1439_v36  ;;  %v4375_v25 = vld [vmem:[#allocation8 + $0x3e0] sm:$0xf] }
 0x10a   :  { %2582 = vmatpush.bf16.msra.mxu1 %v4108_v52  ;;  %v1451_v52 = vadd.f32 %v1450_v63, %v1437_v34  ;;  %v1506_v35 = vpop.f32.mrf.mxu2  ;;  %v4135_v63 = vld [vmem:[#allocation8 + $0x200] sm:$0xf] }
 0x10b   :  { %2568 = vmatpush.bf16.msra.mxu3 %v3980_v46  ;;  %v4168_v46 = vor.u32 %v4787_v40, %v4167_v39  ;;  %v1467_v1 = vadd.f32 %v1466_v56, %v1453_v53  ;;  %v4359_v36 = vld [vmem:[#allocation8 + $0x3c0] sm:$0xf]  ;;  %v4127_v40 = vld [vmem:[#allocation8 + $0x1e8] sm:$0xf]  ;;  %v4831_v56 = vld [vmem:[#allocation8 + $0x3ac] sm:$0xf0] }
 0x10c   :  { %v1465_v58 = vadd.f32 %v1464_v20, %v1451_v52  ;;  %v4801_v20 = vld [vmem:[#allocation8 + $0x2c4] sm:$0xf]  ;;  %v4128_v51 = vor.u32 %v4776_v41, %v4127_v40  ;;  %v4201_v52 = vld [vmem:[#allocation8 + $0x290] sm:$0xf0]  ;;  %v4343_v53 = vld [vmem:[#allocation8 + $0x3a0] sm:$0xf] }
 0x10d   :  { %v1494_v47 = vpop.f32.mrf.mxu3  ;;  %2544 = vmatpush.bf16.msrb.mxu2 %v4168_v46  ;;  %v1481_v16 = vadd.f32 %v1480_v2, %v1467_v1  ;;  %v4236_v24 = vor.u32 %v4801_v20, %v4233_v22  ;;  %v4720_v1 = vld [vmem:[#allocation8 + $0x34] sm:$0xf0] }
 0x10e   :  { %2583 = vmatpush.bf16.msra.mxu1 %v4092_v62  ;;  %v1479_v4 = vadd.f32 %v1478_v32, %v1465_v58  ;;  %v4217_v32 = vld [vmem:[#allocation8 + $0x2b0] sm:$0xf0]  ;;  %v4344_v58 = vor.u32 %v4831_v56, %v4343_v53  ;;  %v4764_v22 = vld [vmem:[#allocation8 + $0x194] sm:$0xf0]  ;;  %v339_v53 = vperm.slane %v5186_v9, 2 }
 0x10f   :  { %2569 = vmatpush.bf16.msra.mxu3 %v3964_v57  ;;  %v4151_v57 = vld [vmem:[#allocation8 + $0x220] sm:$0xf]  ;;  %v1495_v17 = vadd.f32 %v1494_v47, %v1481_v16  ;;  %v4220_v34 = vor.u32 %v4797_v31, %v4217_v32  ;;  %v4079_v16 = vld [vmem:[#allocation8 + $0x188] sm:$0xf]  ;;  %v4760_v31 = vld [vmem:[#allocation8 + $0x174] sm:$0xf0] }
 0x110   :  { %v4152_v62 = vor.u32 %v4783_v37, %v4151_v57  ;;  %v1493_v15 = vadd.f32 %v5204_v21, %v1479_v4  ;;  %v4772_v57 = vld [vmem:[#allocation8 + $0x1d4] sm:$0xf0]  ;;  %v4204_v37 = vor.u32 %v4793_v49, %v4201_v52  ;;  %v4095_v4 = vld [vmem:[#allocation8 + $0x1a8] sm:$0xf]  ;;  %v4738_v32 = vld [vmem:[#allocation8 + $0xcc] sm:$0xf] }
 0x111   :  { %v3969_v49 = vld [vmem:[#allocation8 + $0xb8] sm:$0xf0] }
 0x112   :  { %2584 = vmatpush.bf16.msra.mxu1 %v4076_v11  ;;  %2545 = vmatpush.bf16.msrb.mxu2 %v4152_v62  ;;  %v4249_v11 = vld [vmem:[#allocation8 + $0x2f0] sm:$0xf0]  ;;  %v1508_v23 = vpop.f32.mrf.mxu2  ;;  %v1507_v27 = vadd.f32 %v1506_v35, %v1493_v15  ;;  %v4789_v62 = vld [vmem:[#allocation8 + $0x264] sm:$0xf] }
 0x113   :  { %2570 = vmatpush.bf16.msra.mxu3 %v3948_v3  ;;  %v4779_v3 = vld [vmem:[#allocation8 + $0x20c] sm:$0xf0]  ;;  %v1509_v28 = vadd.f32 %v1508_v23, %v1495_v17  ;;  %v4188_v2 = vor.u32 %v4789_v62, %v4185_v61  ;;  %v4742_v23 = vld [vmem:[#allocation8 + $0xec] sm:$0xf]  ;;  %v3953_v61 = vld [vmem:[#allocation8 + $0x98] sm:$0xf0] }
 0x114   :  { %v4136_v6 = vor.u32 %v4779_v3, %v4135_v63  ;;  %v4327_v63 = vld [vmem:[#allocation8 + $0x380] sm:$0xf]  ;;  %v4827_v3 = vld [vmem:[#allocation8 + $0x38c] sm:$0xf0] }
 0x115   :  { %v1520_v10 = vpop.f32.mrf.mxu3  ;;  %v4811_v62 = vld [vmem:[#allocation8 + $0x30c] sm:$0xf0] }
 0x116   :  { %2585 = vmatpush.bf16.msra.mxu1 %v4060_v18  ;;  %2546 = vmatpush.bf16.msrb.mxu2 %v4136_v6  ;;  %v3968_v18 = vor.u32 %v4736_v13, %v3967_v12  ;;  %v1521_v21 = vadd.f32 %v1520_v10, %v1507_v27  ;;  %v4328_v6 = vor.u32 %v4827_v3, %v4327_v63  ;;  %v4716_v12 = vld [vmem:[#allocation8 + $0x14] sm:$0xf0]  ;;  %v4785_v13 = vld [vmem:[#allocation8 + $0x244] sm:$0xf]  ;;  %v4153_v27 = vld [vmem:[#allocation8 + $0x230] sm:$0xf0] }
 0x117   :  { %2571 = vmatpush.bf16.msra.mxu3 %v3932_v14  ;;  %v4252_v14 = vor.u32 %v4805_v7, %v4249_v11  ;;  %v3887_v11 = vld [vmem:[#allocation8 + $0x8] sm:$0xf] }
 0x11a   :  { %2586 = vmatpush.bf16.msra.mxu1 %v4044_v30  ;;  %2595 = vmatpush.bf16.msra.mxu2 %v4252_v14  ;;  %v3935_v30 = vld [vmem:[#allocation8 + $0x68] sm:$0xf]  ;;  %v4169_v14 = vld [vmem:[#allocation8 + $0x250] sm:$0xf0] }
 0x11b   :  { %2572 = vmatpush.bf16.msra.mxu3 %v3916_v26  ;;  %v4839_v26 = vld [vmem:[#allocation8 + $0x3ec] sm:$0xf0]  ;;  %v3936_v47 = vor.u32 %v4728_v33, %v3935_v30  ;;  %v4172_v17 = vor.u32 %v4785_v13, %v4169_v14 }
 0x11c   :  { %v4376_v50 = vor.u32 %v4839_v26, %v4375_v25  ;;  %v3888_v25 = vor.u32 %v4716_v12, %v3887_v11  ;;  %v4781_v26 = vld [vmem:[#allocation8 + $0x224] sm:$0xf]  ;;  %v4819_v30 = vld [vmem:[#allocation8 + $0x34c] sm:$0xf0]  ;;  %v4015_v11 = vld [vmem:[#allocation8 + $0x108] sm:$0xf] }
 0x11d   :  { %v1522_v8 = vpop.f32.mrf.mxu3  ;;  %v5213_v7 = vpop.f32.mrf.mxu0  ;;  %v4156_v33 = vor.u32 %v4781_v26, %v4153_v27  ;;  %v4726_v12 = vld [vmem:[#allocation8 + $0x6c] sm:$0xf] }
 0x11e   :  { %2587 = vmatpush.bf16.msra.mxu1 %v4028_v54  ;;  %2596 = vmatpush.bf16.msra.mxu2 %v4236_v24  ;;  %v1523_v39 = vadd.f32 %v1522_v8, %v1509_v28  ;;  %v1722_v54 = vmax.f32 %v1521_v21, 0.0  ;;  %v1534_v20 = vpop.f32.mrf.mxu1  ;;  %v4004_v28 = vor.u32 %v4742_v23, %v4001_v55  ;;  %v4063_v21 = vld [vmem:[#allocation8 + $0x168] sm:$0xf]  ;;  %v3985_v8 = vld [vmem:[#allocation8 + $0xd8] sm:$0xf0] }
 0x11f   :  { %2573 = vmatpush.bf16.msra.mxu3 %v3900_v38  ;;  %2553 = vmatpush.bf16.msrb.mxu0 %v4376_v50  ;;  %v4835_v38 = vld [vmem:[#allocation8 + $0x3cc] sm:$0xf0]  ;;  %v4080_v50 = vor.u32 %v4764_v22, %v4079_v16  ;;  %v4064_v41 = vor.u32 %v4760_v31, %v4063_v21  ;;  %v1535_v63 = vadd.f32 %v1534_v20, %v339_v53  ;;  %v4833_v16 = vld [vmem:[#allocation8 + $0x3c4] sm:$0xf]  ;;  %v4774_v22 = vld [vmem:[#allocation8 + $0x1ec] sm:$0xf] }
 0x120   :  { %v4360_v43 = vor.u32 %v4835_v38, %v4359_v36  ;;  %v1726_v46 = vmax.f32 %v1523_v39, 0.0  ;;  %v4777_v38 = vld [vmem:[#allocation8 + $0x204] sm:$0xf]  ;;  %v4137_v39 = vld [vmem:[#allocation8 + $0x210] sm:$0xf0] }
 0x121   :  { %v4129_v20 = vld [vmem:[#allocation8 + $0x1f8] sm:$0xf0]  ;;  %v4722_v26 = vld [vmem:[#allocation8 + $0x4c] sm:$0xf]  ;;  %v4345_v21 = vld [vmem:[#allocation8 + $0x3b0] sm:$0xf0] }
 0x122   :  { %2588 = vmatpush.bf16.msra.mxu1 %v4012_v42  ;;  %2597 = vmatpush.bf16.msra.mxu2 %v4220_v34  ;;  %v5210_v35 = vpack.c.bf16 %v1726_v46, %v1722_v54  ;;  %v3903_v42 = vld [vmem:[#allocation8 + $0x28] sm:$0xf]  ;;  %v4279_v54 = vld [vmem:[#allocation8 + $0x320] sm:$0xf]  ;;  %v4815_v46 = vld [vmem:[#allocation8 + $0x32c] sm:$0xf0]  ;;  %v4132_v27 = vor.u32 %v4774_v22, %v4129_v20 }
 0x123   :  { %2574 = vmatpush.bf16.msra.mxu3 %v3884_v60  ;;  %2554 = vmatpush.bf16.msrb.mxu0 %v4360_v43  ;;  %v4111_v60 = vld [vmem:[#allocation8 + $0x1c8] sm:$0xf]  ;;  %v3904_v10 = vor.u32 %v4720_v1, %v3903_v42  ;;  %v3988_v43 = vor.u32 %v4738_v32, %v3985_v8  ;;  %v4280_v52 = vor.u32 %v4815_v46, %v4279_v54  ;;  %v4263_v42 = vld [vmem:[#allocation8 + $0x300] sm:$0xf]  ;;  %v4837_v1 = vld [vmem:[#allocation8 + $0x3e4] sm:$0xf] }
 0x124   :  { %2533 = vmatmul.bf16.vlgmr.msrb.gmra.mxu1 %v5210_v35  ;;  %v4112_v0 = vor.u32 %v4772_v57, %v4111_v60  ;;  %v4031_v60 = vld [vmem:[#allocation8 + $0x128] sm:$0xf]  ;;  %v4752_v57 = vld [vmem:[#allocation8 + $0x134] sm:$0xf0]  ;;  %v4770_v31 = vld [vmem:[#allocation8 + $0x1cc] sm:$0xf] }
 0x125   :  { %v5215_v40 = vpop.f32.mrf.mxu0  ;;  %v4113_v32 = vld [vmem:[#allocation8 + $0x1d8] sm:$0xf0]  ;;  %v4813_v22 = vld [vmem:[#allocation8 + $0x324] sm:$0xf]  ;;  %v4281_v20 = vld [vmem:[#allocation8 + $0x330] sm:$0xf0] }
 0x126   :  { %2575 = vmatmul.bf16.vlgmr.msra.gmra.mxu3 %v5201_v45  ;;  %2637 = vmatpush.bf16.msrb.mxu1 %v4128_v51  ;;  %v4140_v51 = vor.u32 %v4777_v38, %v4137_v39  ;;  %v1536_v56 = vpop.f32.mrf.mxu1  ;;  %v4116_v38 = vor.u32 %v4770_v31, %v4113_v32  ;;  %v3905_v39 = vld [vmem:[#allocation8 + $0x38] sm:$0xf0]  ;;  %v340_v31 = vperm.slane %v5186_v9, 3  ;;  %v4750_v32 = vld [vmem:[#allocation8 + $0x12c] sm:$0xf] }
 0x127   :  { %2623 = vmatpush.bf16.msrb.mxu3 %v4000_v59  ;;  %v3920_v59 = vor.u32 %v4724_v48, %v3919_v44  ;;  %2598 = vmatpush.bf16.msra.mxu2 %v4204_v37  ;;  %v4047_v44 = vld [vmem:[#allocation8 + $0x148] sm:$0xf]  ;;  %v4734_v48 = vld [vmem:[#allocation8 + $0xac] sm:$0xf] }
 0x128   :  { %2555 = vmatpush.bf16.msrb.mxu0 %v4344_v58  ;;  %v3972_v58 = vor.u32 %v4734_v48, %v3969_v49 }
 0x129   :  { %v1548_v36 = vpop.f32.mrf.mxu3 }
 0x12a   :  { %2638 = vmatpush.bf16.msrb.mxu1 %v4112_v0  ;;  %v4264_v0 = vor.u32 %v4811_v62, %v4263_v42  ;;  %v1576_v13 = vpop.f32.mrf.mxu2  ;;  %v4762_v42 = vld [vmem:[#allocation8 + $0x18c] sm:$0xf]  ;;  %v4081_v62 = vld [vmem:[#allocation8 + $0x198] sm:$0xf0] }
 0x12b   :  { %2624 = vmatpush.bf16.msrb.mxu3 %v3984_v5  ;;  %v4768_v5 = vld [vmem:[#allocation8 + $0x1b4] sm:$0xf0]  ;;  %2599 = vmatpush.bf16.msra.mxu2 %v4188_v2  ;;  %v4377_v2 = vld [vmem:[#allocation8 + $0x3f0] sm:$0xf0] }
 0x12c   :  { %v4096_v15 = vor.u32 %v4768_v5, %v4095_v4  ;;  %2556 = vmatpush.bf16.msrb.mxu0 %v4328_v6  ;;  %v4380_v3 = vor.u32 %v4837_v1, %v4377_v2  ;;  %v4032_v5 = vor.u32 %v4752_v57, %v4031_v60  ;;  %v3889_v57 = vld [vmem:[#allocation8 + $0x18] sm:$0xf0] }
 0x12d   :  { %v5220_v4 = vpop.f32.mrf.mxu0 }
 0x12e   :  { %2639 = vmatpush.bf16.msrb.mxu1 %v4096_v15  ;;  %v3937_v15 = vld [vmem:[#allocation8 + $0x78] sm:$0xf0] }
 0x12f   :  { %2625 = vmatpush.bf16.msrb.mxu3 %v3968_v18  ;;  %v4311_v18 = vld [vmem:[#allocation8 + $0x360] sm:$0xf]  ;;  %2600 = vmatpush.bf16.msra.mxu2 %v4172_v17  ;;  %v4361_v17 = vld [vmem:[#allocation8 + $0x3d0] sm:$0xf0] }
 0x130   :  { %v4312_v24 = vor.u32 %v4823_v19, %v4311_v18  ;;  %v1549_v18 = vadd.f32 %v1548_v36, %v1535_v63  ;;  %v1537_v19 = vadd.f32 %v1536_v56, %v339_v53  ;;  %v4364_v23 = vor.u32 %v4833_v16, %v4361_v17  ;;  %v4714_v53 = vld [vmem:[#allocation8 + $0xc] sm:$0xf]  ;;  %v4255_v16 = vld [vmem:[#allocation8 + $0x2e8] sm:$0xf]  ;;  %v4808_v17 = vld [vmem:[#allocation8 + $0x2f4] sm:$0xf0] }
 0x131   :  { %v1550_v14 = vpop.f32.mrf.mxu3  ;;  %v3892_v1 = vor.u32 %v4714_v53, %v3889_v57  ;;  %v4084_v63 = vor.u32 %v4762_v42, %v4081_v62  ;;  %v4792_v53 = vld [vmem:[#allocation8 + $0x274] sm:$0xf0]  ;;  %v4175_v62 = vld [vmem:[#allocation8 + $0x248] sm:$0xf] }
 0x132   :  { %2557 = vmatpush.bf16.msrb.mxu0 %v4312_v24  ;;  %2640 = vmatpush.bf16.msrb.mxu1 %v4080_v50  ;;  %v3921_v50 = vld [vmem:[#allocation8 + $0x58] sm:$0xf0]  ;;  %v1578_v49 = vpop.f32.mrf.mxu2 }
 0x133   :  { %2626 = vmatpush.bf16.msrb.mxu3 %v3952_v29  ;;  %v4295_v29 = vld [vmem:[#allocation8 + $0x340] sm:$0xf]  ;;  %2601 = vmatpush.bf16.msra.mxu2 %v4156_v33  ;;  %v3924_v33 = vor.u32 %v4722_v26, %v3921_v50  ;;  %v4256_v26 = vor.u32 %v4808_v17, %v4255_v16  ;;  %v4239_v50 = vld [vmem:[#allocation8 + $0x2c8] sm:$0xf]  ;;  %v4806_v17 = vld [vmem:[#allocation8 + $0x2ec] sm:$0xf] }
 0x134   :  { %v4296_v34 = vor.u32 %v4819_v30, %v4295_v29  ;;  %2589 = vmatmul.bf16.vlgmr.msra.gmra.mxu1 %v5210_v35  ;;  %v1563_v29 = vadd.f32 %v5213_v7, %v1549_v18  ;;  %v1551_v30 = vadd.f32 %v1550_v14, %v1537_v19  ;;  %v4766_v7 = vld [vmem:[#allocation8 + $0x1ac] sm:$0xf] }
 0x135   :  { %v1620_v46 = vpop.f32.mrf.mxu0 }
 0x136   :  { %2558 = vmatpush.bf16.msrb.mxu0 %v4296_v34  ;;  %2641 = vmatpush.bf16.msrb.mxu1 %v4064_v41  ;;  %v4718_v34 = vld [vmem:[#allocation8 + $0x2c] sm:$0xf]  ;;  %v4825_v41 = vld [vmem:[#allocation8 + $0x384] sm:$0xf]  ;;  %v1565_v54 = vadd.f32 %v5215_v40, %v1551_v30  ;;  %v4265_v30 = vld [vmem:[#allocation8 + $0x310] sm:$0xf0] }
 0x137   :  { %2627 = vmatpush.bf16.msrb.mxu3 %v3936_v47  ;;  %v4756_v47 = vld [vmem:[#allocation8 + $0x154] sm:$0xf0]  ;;  %2602 = vmatpush.bf16.msra.mxu2 %v4140_v51 }
 0x138   :  { %v4048_v37 = vor.u32 %v4756_v47, %v4047_v44  ;;  %v1577_v44 = vadd.f32 %v1576_v13, %v1563_v29  ;;  %v4097_v47 = vld [vmem:[#allocation8 + $0x1b8] sm:$0xf0]  ;;  %v4809_v29 = vld [vmem:[#allocation8 + $0x304] sm:$0xf] }
 0x139   :  { %v4100_v60 = vor.u32 %v4766_v7, %v4097_v47  ;;  %v4207_v7 = vld [vmem:[#allocation8 + $0x288] sm:$0xf]  ;;  %v4796_v47 = vld [vmem:[#allocation8 + $0x294] sm:$0xf0] }
 0x13a   :  { %2559 = vmatpush.bf16.msrb.mxu0 %v4280_v52  ;;  %2642 = vmatpush.bf16.msrb.mxu1 %v4048_v37  ;;  %v3908_v52 = vor.u32 %v4718_v34, %v3905_v39  ;;  %v4821_v37 = vld [vmem:[#allocation8 + $0x364] sm:$0xf] }
 0x13b   :  { %2628 = vmatpush.bf16.msrb.mxu3 %v3920_v59  ;;  %v4730_v59 = vld [vmem:[#allocation8 + $0x8c] sm:$0xf] }
 0x13c   :  { %v3956_v6 = vor.u32 %v4730_v59, %v3953_v61  ;;  %v1579_v59 = vadd.f32 %v1578_v49, %v1565_v54  ;;  %v4017_v54 = vld [vmem:[#allocation8 + $0x118] sm:$0xf0] }
 0x13e   :  { %2560 = vmatpush.bf16.msrb.mxu0 %v4264_v0  ;;  %v1590_v55 = vpop.f32.mrf.mxu1  ;;  %2643 = vmatpush.bf16.msrb.mxu1 %v4032_v5  ;;  %v4297_v5 = vld [vmem:[#allocation8 + $0x350] sm:$0xf0] }
 0x13f   :  { %2629 = vmatpush.bf16.msrb.mxu3 %v3904_v10  ;;  %v4748_v10 = vld [vmem:[#allocation8 + $0x114] sm:$0xf0]  ;;  %v1591_v51 = vadd.f32 %v1590_v55, %v1577_v44  ;;  %v4746_v44 = vld [vmem:[#allocation8 + $0x10c] sm:$0xf] }
 0x140   :  { %v4016_v24 = vor.u32 %v4748_v10, %v4015_v11  ;;  %v4758_v10 = vld [vmem:[#allocation8 + $0x16c] sm:$0xf] }
 0x142   :  { %2609 = vmatpush.bf16.msra.mxu0 %v4380_v3  ;;  %2644 = vmatpush.bf16.msrb.mxu1 %v4016_v24  ;;  %v4817_v3 = vld [vmem:[#allocation8 + $0x344] sm:$0xf]  ;;  %v4754_v24 = vld [vmem:[#allocation8 + $0x14c] sm:$0xf] }
 0x143   :  { %2630 = vmatpush.bf16.msrb.mxu3 %v3888_v25  ;;  %v3940_v25 = vor.u32 %v4726_v12, %v3937_v15  ;;  %v4065_v12 = vld [vmem:[#allocation8 + $0x178] sm:$0xf0]  ;;  %v4300_v13 = vor.u32 %v4817_v3, %v4297_v5  ;;  %v1646_v15 = vpop.f32.mrf.mxu0  ;;  %v4784_v3 = vld [vmem:[#allocation8 + $0x234] sm:$0xf0] }
 0x144   :  { %v4068_v19 = vor.u32 %v4758_v10, %v4065_v12 }
 0x145   :  { %2645 = vmatmul.bf16.vlgmr.msrb.gmra.mxu1 %v5210_v35 }
 0x146   :  { %2631 = vmatmul.bf16.vlgmr.msrb.gmra.mxu3 %v5201_v45  ;;  %2610 = vmatpush.bf16.msra.mxu0 %v4364_v23  ;;  %v1592_v56 = vpop.f32.mrf.mxu1 }
 0x147   :  { %2679 = vmatpush.bf16.msra.mxu3 %v4004_v28  ;;  %v4829_v28 = vld [vmem:[#allocation8 + $0x3a4] sm:$0xf]  ;;  %2693 = vmatpush.bf16.msra.mxu1 %v4132_v27  ;;  %v1593_v0 = vadd.f32 %v1592_v56, %v1579_v59 }
 0x148   :  { %v4348_v8 = vor.u32 %v4829_v28, %v4345_v21  ;;  %v4804_v28 = vld [vmem:[#allocation8 + $0x2d4] sm:$0xf0] }
 0x149   :  { %v1604_v36 = vpop.f32.mrf.mxu3  ;;  %v4240_v34 = vor.u32 %v4804_v28, %v4239_v50  ;;  %v4383_v50 = vld [vmem:[#allocation8 + $0x3e8] sm:$0xf]  ;;  %v4840_v28 = vld [vmem:[#allocation8 + $0x3f4] sm:$0xf0] }
 0x14a   :  { %2611 = vmatpush.bf16.msra.mxu0 %v4348_v8  ;;  %v1605_v40 = vadd.f32 %v1604_v36, %v1591_v51  ;;  %v1632_v18 = vpop.f32.mrf.mxu2  ;;  %v4033_v8 = vld [vmem:[#allocation8 + $0x138] sm:$0xf0]  ;;  %v4800_v36 = vld [vmem:[#allocation8 + $0x2b4] sm:$0xf0]  ;;  %v4208_v51 = vor.u32 %v4796_v47, %v4207_v7  ;;  %v4335_v47 = vld [vmem:[#allocation8 + $0x388] sm:$0xf] }
 0x14b   :  { %2680 = vmatpush.bf16.msra.mxu3 %v3988_v43  ;;  %v4329_v43 = vld [vmem:[#allocation8 + $0x390] sm:$0xf0]  ;;  %2694 = vmatpush.bf16.msra.mxu1 %v4116_v38  ;;  %v4036_v39 = vor.u32 %v4750_v32, %v4033_v8  ;;  %v4798_v32 = vld [vmem:[#allocation8 + $0x2ac] sm:$0xf]  ;;  %v4225_v8 = vld [vmem:[#allocation8 + $0x2b8] sm:$0xf0] }
 0x14c   :  { %v4332_v48 = vor.u32 %v4825_v41, %v4329_v43  ;;  %v1633_v41 = vadd.f32 %v1632_v18, %v340_v31  ;;  %v1648_v43 = vpop.f32.mrf.mxu0  ;;  %v4257_v18 = vld [vmem:[#allocation8 + $0x2f8] sm:$0xf0] }
 0x14d   :  { %v4193_v7 = vld [vmem:[#allocation8 + $0x278] sm:$0xf0] }
 0x14e   :  { %2612 = vmatpush.bf16.msra.mxu0 %v4332_v48  ;;  %v4020_v48 = vor.u32 %v4746_v44, %v4017_v54  ;;  %v1647_v49 = vadd.f32 %v1646_v15, %v1633_v41  ;;  %v4143_v15 = vld [vmem:[#allocation8 + $0x208] sm:$0xf]  ;;  %v4209_v41 = vld [vmem:[#allocation8 + $0x298] sm:$0xf0]  ;;  %v4832_v44 = vld [vmem:[#allocation8 + $0x3b4] sm:$0xf0] }
 0x14f   :  { %2681 = vmatpush.bf16.msra.mxu3 %v3972_v58  ;;  %v4313_v58 = vld [vmem:[#allocation8 + $0x370] sm:$0xf0]  ;;  %2695 = vmatpush.bf16.msra.mxu1 %v4100_v60 }
 0x150   :  { %v4316_v61 = vor.u32 %v4821_v37, %v4313_v58 }
 0x151   :  { %v1606_v2 = vpop.f32.mrf.mxu3 }
 0x152   :  { %v1607_v11 = vadd.f32 %v1606_v2, %v1593_v0  ;;  %2613 = vmatpush.bf16.msra.mxu0 %v4316_v61  ;;  %v4788_v61 = vld [vmem:[#allocation8 + $0x254] sm:$0xf0] }
 0x153   :  { %2682 = vmatpush.bf16.msra.mxu3 %v3956_v6  ;;  %v1619_v6 = vadd.f32 %v5220_v4, %v1605_v40  ;;  %2696 = vmatpush.bf16.msra.mxu1 %v4084_v63  ;;  %v4284_v4 = vor.u32 %v4813_v22, %v4281_v20  ;;  %v4159_v63 = vld [vmem:[#allocation8 + $0x228] sm:$0xf] }
 0x154   :  { %v1621_v14 = vadd.f32 %v1620_v46, %v1607_v11  ;;  %v1634_v46 = vpop.f32.mrf.mxu2  ;;  %v4160_v12 = vor.u32 %v4784_v3, %v4159_v63  ;;  %v4816_v63 = vld [vmem:[#allocation8 + $0x334] sm:$0xf0] }
 0x155   :  { %v1723_v23 = vmax.f32 %v1619_v6, 0.0  ;;  %v1635_v37 = vadd.f32 %v1634_v46, %v340_v31  ;;  %v4384_v31 = vor.u32 %v4840_v28, %v4383_v50  ;;  %v4814_v50 = vld [vmem:[#allocation8 + $0x32c] sm:$0xf]  ;;  %v4289_v28 = vld [vmem:[#allocation8 + $0x338] sm:$0xf0] }
 0x156   :  { %v1727_v55 = vmax.f32 %v1621_v14, 0.0  ;;  %2614 = vmatpush.bf16.msra.mxu0 %v4300_v13 }
 0x157   :  { %2683 = vmatpush.bf16.msra.mxu3 %v3940_v25  ;;  %v4049_v25 = vld [vmem:[#allocation8 + $0x158] sm:$0xf0]  ;;  %2697 = vmatpush.bf16.msra.mxu1 %v4068_v19  ;;  %v1649_v0 = vadd.f32 %v1648_v43, %v1635_v37  ;;  %v4351_v43 = vld [vmem:[#allocation8 + $0x3a8] sm:$0xf] }
 0x158   :  { %v5227_v27 = vpack.c.bf16 %v1727_v55, %v1723_v23  ;;  %v4052_v21 = vor.u32 %v4754_v24, %v4049_v25  ;;  %v4260_v55 = vor.u32 %v4806_v17, %v4257_v18  ;;  %v4802_v25 = vld [vmem:[#allocation8 + $0x2cc] sm:$0xf]  ;;  %v4352_v46 = vor.u32 %v4832_v44, %v4351_v43  ;;  %v4353_v18 = vld [vmem:[#allocation8 + $0x3b8] sm:$0xf0] }
 0x159   :  { %v4830_v17 = vld [vmem:[#allocation8 + $0x3ac] sm:$0xf] }
 0x15a   :  { %2547 = vmatmul.bf16.vlgmr.msrb.gmra.mxu2 %v5227_v27  ;;  %2615 = vmatpush.bf16.msra.mxu0 %v4284_v4  ;;  %v4241_v4 = vld [vmem:[#allocation8 + $0x2d8] sm:$0xf0]  ;;  %v4842_v43 = vld [vmem:[#allocation11 + $0x8] sm:$0xff] }
 0x15b   :  { %2684 = vmatpush.bf16.msra.mxu3 %v3924_v33  ;;  %v4268_v33 = vor.u32 %v4809_v29, %v4265_v30  ;;  %2651 = vmatpush.bf16.msrb.mxu2 %v4256_v26  ;;  %v4244_v30 = vor.u32 %v4802_v25, %v4241_v4  ;;  %v4305_v4 = vld [vmem:[#allocation8 + $0x358] sm:$0xf0]  ;;  %v4854_v44 = vld [vmem:[#allocation11 + $0x68] sm:$0xff] }
 0x15c   :  { %2698 = vmatpush.bf16.msra.mxu1 %v4052_v21 }
 0x15e   :  { %v1660_v38 = vpop.f32.mrf.mxu1  ;;  %2616 = vmatpush.bf16.msra.mxu0 %v4268_v33 }
 0x15f   :  { %2685 = vmatpush.bf16.msra.mxu3 %v3908_v52  ;;  %2652 = vmatpush.bf16.msrb.mxu2 %v4240_v34  ;;  %v4191_v52 = vld [vmem:[#allocation8 + $0x268] sm:$0xf]  ;;  %v1661_v60 = vadd.f32 %v1660_v38, %v1647_v49 }
 0x160   :  { %2699 = vmatpush.bf16.msra.mxu1 %v4036_v39  ;;  %v4192_v59 = vor.u32 %v4792_v53, %v4191_v52  ;;  %v4367_v34 = vld [vmem:[#allocation8 + $0x3c8] sm:$0xf]  ;;  %v4794_v39 = vld [vmem:[#allocation8 + $0x28c] sm:$0xf]  ;;  %v4177_v53 = vld [vmem:[#allocation8 + $0x258] sm:$0xf0] }
 0x161   :  { %v1702_v40 = vpop.f32.mrf.mxu0  ;;  %v4212_v54 = vor.u32 %v4794_v39, %v4209_v41  ;;  %v4786_v52 = vld [vmem:[#allocation8 + $0x24c] sm:$0xf]  ;;  %v4843_v39 = vld [vmem:[#allocation11 + $0x10] sm:$0xff] }
 0x162   :  { %v4855_v41 = vld [vmem:[#allocation11 + $0x70] sm:$0xff] }
 0x163   :  { %2686 = vmatpush.bf16.msra.mxu3 %v3892_v1  ;;  %v4176_v1 = vor.u32 %v4788_v61, %v4175_v62 }
 0x164   :  { %2700 = vmatpush.bf16.msra.mxu1 %v4020_v48  ;;  %v4828_v48 = vld [vmem:[#allocation8 + $0x394] sm:$0xf0] }
 0x166   :  { %2687 = vmatmul.bf16.vlgmr.msra.gmra.mxu3 %v5201_v45  ;;  %v4223_v45 = vld [vmem:[#allocation8 + $0x2a8] sm:$0xf]  ;;  %v1662_v56 = vpop.f32.mrf.mxu1 }
 0x167   :  { %v4224_v9 = vor.u32 %v4800_v36, %v4223_v45  ;;  %2701 = vmatmul.bf16.vlgmr.msra.gmra.mxu1 %v5210_v35  ;;  %v1663_v5 = vadd.f32 %v1662_v56, %v1649_v0  ;;  %v4780_v35 = vld [vmem:[#allocation8 + $0x214] sm:$0xf0]  ;;  %v4228_v36 = vor.u32 %v4798_v32, %v4225_v8  ;;  %v4319_v56 = vld [vmem:[#allocation8 + $0x368] sm:$0xf]  ;;  %v4778_v0 = vld [vmem:[#allocation8 + $0x20c] sm:$0xf] }
 0x168   :  { %v4144_v20 = vor.u32 %v4780_v35, %v4143_v15  ;;  %v4836_v45 = vld [vmem:[#allocation8 + $0x3d4] sm:$0xf0]  ;;  %v4834_v15 = vld [vmem:[#allocation8 + $0x3cc] sm:$0xf]  ;;  %v4369_v35 = vld [vmem:[#allocation8 + $0x3d8] sm:$0xf0] }
 0x169   :  { %2653 = vmatpush.bf16.msrb.mxu2 %v4224_v9  ;;  %v1674_v57 = vpop.f32.mrf.mxu3  ;;  %v1704_v19 = vpop.f32.mrf.mxu0  ;;  %v4368_v38 = vor.u32 %v4836_v45, %v4367_v34  ;;  %v4790_v9 = vld [vmem:[#allocation8 + $0x26c] sm:$0xf]  ;;  %v4848_v32 = vld [vmem:[#allocation11 + $0x38] sm:$0xff]  ;;  %v4847_v8 = vld [vmem:[#allocation11 + $0x30] sm:$0xff] }
 0x16a   :  { %v1688_v58 = vpop.f32.mrf.mxu2  ;;  %v1675_v42 = vadd.f32 %v1674_v57, %v1661_v60  ;;  %2603 = vmatmul.bf16.vlgmr.msra.gmra.mxu2 %v5227_v27  ;;  %v4196_v49 = vor.u32 %v4790_v9, %v4193_v7  ;;  %v4824_v60 = vld [vmem:[#allocation8 + $0x374] sm:$0xf0]  ;;  %v4180_v57 = vor.u32 %v4786_v52, %v4177_v53  ;;  %3007 = vmatpush.bf16.msrb.mxu3 %v4848_v32  ;;  %v4846_v34 = vld [vmem:[#allocation11 + $0x28] sm:$0xff]  ;;  %v4845_v45 = vld [vmem:[#allocation11 + $0x20] sm:$0xff] }
 0x16b   :  { %v4320_v37 = vor.u32 %v4824_v60, %v4319_v56  ;;  %v4864_v9 = vld [vmem:[#allocation11 + $0xb8] sm:$0xff]  ;;  %v4850_v52 = vld [vmem:[#allocation11 + $0x48] sm:$0xff] }
 0x16c   :  { %v1689_v2 = vadd.f32 %v1688_v58, %v1675_v42  ;;  %v4782_v58 = vld [vmem:[#allocation8 + $0x22c] sm:$0xf]  ;;  %v4820_v42 = vld [vmem:[#allocation8 + $0x354] sm:$0xf0]  ;;  %v5241_v56 = vld [vmem:[#allocation10] sm:$0xf] }
 0x16d   :  { %2654 = vmatpush.bf16.msrb.mxu2 %v4208_v51  ;;  %v4336_v51 = vor.u32 %v4828_v48, %v4335_v47  ;;  %v4862_v53 = vld [vmem:[#allocation11 + $0xa8] sm:$0xff] }
 0x16e   :  { %v1716_v6 = vpop.f32.mrf.mxu1  ;;  %v1703_v13 = vadd.f32 %v1702_v40, %v1689_v2  ;;  %v4303_v40 = vld [vmem:[#allocation8 + $0x348] sm:$0xf]  ;;  %3008 = vmatpush.bf16.msrb.mxu3 %v4847_v8 }
 0x16f   :  { %v4304_v61 = vor.u32 %v4820_v42, %v4303_v40  ;;  %v4287_v2 = vld [vmem:[#allocation8 + $0x328] sm:$0xf]  ;;  %v1863_v40 = vperm.slane %v5241_v56, 0  ;;  %v4860_v42 = vld [vmem:[#allocation11 + $0x98] sm:$0xff] }
 0x170   :  { %v1717_v23 = vadd.f32 %v1716_v6, %v1703_v13  ;;  %v4271_v6 = vld [vmem:[#allocation8 + $0x308] sm:$0xf] }
 0x171   :  { %2655 = vmatpush.bf16.msrb.mxu2 %v4192_v59  ;;  %v1676_v11 = vpop.f32.mrf.mxu3  ;;  %v4161_v59 = vld [vmem:[#allocation8 + $0x238] sm:$0xf0] }
 0x172   :  { %v1677_v10 = vadd.f32 %v1676_v11, %v1663_v5  ;;  %v1690_v14 = vpop.f32.mrf.mxu2  ;;  %v1724_v21 = vmax.f32 %v1717_v23, 0.0  ;;  %v4164_v62 = vor.u32 %v4782_v58, %v4161_v59  ;;  %v4288_v5 = vor.u32 %v4816_v63, %v4287_v2  ;;  %v4812_v11 = vld [vmem:[#allocation8 + $0x314] sm:$0xf0]  ;;  %3009 = vmatpush.bf16.msrb.mxu3 %v4846_v34 }
 0x173   :  { %v4272_v13 = vor.u32 %v4812_v11, %v4271_v6  ;;  %v4859_v2 = vld [vmem:[#allocation11 + $0x90] sm:$0xff] }
 0x174   :  { %v1691_v16 = vadd.f32 %v1690_v14, %v1677_v10  ;;  %v4838_v10 = vld [vmem:[#allocation8 + $0x3ec] sm:$0xf] }
 0x175   :  { %2656 = vmatpush.bf16.msrb.mxu2 %v4176_v1  ;;  %v4145_v1 = vld [vmem:[#allocation8 + $0x218] sm:$0xf0] }
 0x176   :  { %v1705_v22 = vadd.f32 %v1704_v19, %v1691_v16  ;;  %v1718_v24 = vpop.f32.mrf.mxu1  ;;  %v4148_v3 = vor.u32 %v4778_v0, %v4145_v1  ;;  %v4372_v16 = vor.u32 %v4834_v15, %v4369_v35  ;;  %v4356_v19 = vor.u32 %v4830_v17, %v4353_v18  ;;  %3010 = vmatpush.bf16.msrb.mxu3 %v4845_v45  ;;  %v4857_v17 = vld [vmem:[#allocation11 + $0x80] sm:$0xff]  ;;  %v4872_v18 = vld [vmem:[#allocation11 + $0xf8] sm:$0xff] }
 0x178   :  { %v1719_v26 = vadd.f32 %v1718_v24, %v1705_v22  ;;  %v4826_v22 = vld [vmem:[#allocation8 + $0x38c] sm:$0xf]  ;;  %v4321_v24 = vld [vmem:[#allocation8 + $0x378] sm:$0xf0] }
 0x179   :  { %2657 = vmatpush.bf16.msrb.mxu2 %v4160_v12  ;;  %v4385_v12 = vld [vmem:[#allocation8 + $0x3f8] sm:$0xf0] }
 0x17a   :  { %v1728_v29 = vmax.f32 %v1719_v26, 0.0  ;;  %v4388_v14 = vor.u32 %v4838_v10, %v4385_v12 }
 0x17c   :  { %v5233_v33 = vpack.c.bf16 %v1728_v29, %v1724_v21  ;;  %v4292_v21 = vor.u32 %v4814_v50, %v4289_v28  ;;  %v4810_v29 = vld [vmem:[#allocation8 + $0x30c] sm:$0xf] }
 0x17d   :  { %2658 = vmatpush.bf16.msrb.mxu2 %v4144_v20  ;;  %v4337_v20 = vld [vmem:[#allocation8 + $0x398] sm:$0xf0] }
 0x17e   :  { %2561 = vmatmul.bf16.vlgmr.msrb.gmra.mxu0 %v5233_v33  ;;  %v4340_v23 = vor.u32 %v4826_v22, %v4337_v20 }
 0x17f   :  { %2665 = vmatpush.bf16.msrb.mxu0 %v4384_v31 }
 0x180   :  { %2659 = vmatmul.bf16.vlgmr.msrb.gmra.mxu2 %v5227_v27 }
 0x181   :  { %2707 = vmatpush.bf16.msra.mxu2 %v4260_v55  ;;  %v4822_v55 = vld [vmem:[#allocation8 + $0x36c] sm:$0xf] }
 0x182   :  { %v4324_v25 = vor.u32 %v4822_v55, %v4321_v24  ;;  %v4871_v55 = vld [vmem:[#allocation11 + $0xf0] sm:$0xff] }
 0x183   :  { %2666 = vmatpush.bf16.msrb.mxu0 %v4368_v38  ;;  %v4856_v38 = vld [vmem:[#allocation11 + $0x78] sm:$0xff] }
 0x184   :  { %3021 = vmatpush.bf16.msrb.mxu1 %v4856_v38 }
 0x185   :  { %2708 = vmatpush.bf16.msra.mxu2 %v4244_v30  ;;  %v4273_v30 = vld [vmem:[#allocation8 + $0x318] sm:$0xf0] }
 0x186   :  { %v4276_v31 = vor.u32 %v4810_v29, %v4273_v30  ;;  %v4869_v29 = vld [vmem:[#allocation11 + $0xe0] sm:$0xff] }
 0x187   :  { %2667 = vmatpush.bf16.msrb.mxu0 %v4352_v46  ;;  %v4852_v46 = vld [vmem:[#allocation11 + $0x58] sm:$0xff] }
 0x188   :  { %3022 = vmatpush.bf16.msrb.mxu1 %v4855_v41  ;;  %v4868_v41 = vld [vmem:[#allocation11 + $0xd8] sm:$0xff] }
 0x189   :  { %2709 = vmatpush.bf16.msra.mxu2 %v4228_v36  ;;  %v4844_v36 = vld [vmem:[#allocation11 + $0x18] sm:$0xff]  ;;  %v2520_v47 = vpop.f32.mrf.mxu3 }
 0x18a   :  { %3011 = vmatpush.bf16.msrb.mxu3 %v4844_v36 }
 0x18b   :  { %2668 = vmatpush.bf16.msrb.mxu0 %v4336_v51  ;;  %v4863_v51 = vld [vmem:[#allocation11 + $0xb0] sm:$0xff] }
 0x18c   :  { %3023 = vmatpush.bf16.msrb.mxu1 %v4854_v44 }
 0x18d   :  { %2710 = vmatpush.bf16.msra.mxu2 %v4212_v54  ;;  %v4853_v54 = vld [vmem:[#allocation11 + $0x60] sm:$0xff] }
 0x18e   :  { %2617 = vmatmul.bf16.vlgmr.msra.gmra.mxu0 %v5233_v33  ;;  %3012 = vmatpush.bf16.msrb.mxu3 %v4843_v39 }
 0x18f   :  { %2669 = vmatpush.bf16.msrb.mxu0 %v4320_v37  ;;  %v4861_v37 = vld [vmem:[#allocation11 + $0xa0] sm:$0xff] }
 0x190   :  { %3024 = vmatpush.bf16.msrb.mxu1 %v4853_v54 }
 0x191   :  { %2711 = vmatpush.bf16.msra.mxu2 %v4196_v49  ;;  %v4851_v49 = vld [vmem:[#allocation11 + $0x50] sm:$0xff]  ;;  %v2522_v58 = vpop.f32.mrf.mxu3 }
 0x192   :  { %3013 = vmatpush.bf16.msrb.mxu3 %v4842_v43  ;;  %v2523_v0 = vadd.f32 %v2522_v58, %v1863_v40  ;;  %v1865_v43 = vperm.slane %v5241_v56, 2 }
 0x193   :  { %2670 = vmatpush.bf16.msrb.mxu0 %v4304_v61  ;;  %v2521_v61 = vadd.f32 %v2520_v47, %v1863_v40 }
 0x194   :  { %3025 = vmatpush.bf16.msrb.mxu1 %v4852_v46 }
 0x195   :  { %2712 = vmatpush.bf16.msra.mxu2 %v4180_v57  ;;  %v4849_v57 = vld [vmem:[#allocation11 + $0x40] sm:$0xff] }
 0x197   :  { %2671 = vmatpush.bf16.msrb.mxu0 %v4288_v5 }
 0x198   :  { %3026 = vmatpush.bf16.msrb.mxu1 %v4851_v49  ;;  %v4866_v49 = vld [vmem:[#allocation11 + $0xc8] sm:$0xff] }
 0x199   :  { %2713 = vmatpush.bf16.msra.mxu2 %v4164_v62 }
 0x19b   :  { %2672 = vmatpush.bf16.msrb.mxu0 %v4272_v13  ;;  %v4858_v13 = vld [vmem:[#allocation11 + $0x88] sm:$0xff] }
 0x19c   :  { %3027 = vmatpush.bf16.msrb.mxu1 %v4850_v52 }
 0x19d   :  { %2714 = vmatpush.bf16.msra.mxu2 %v4148_v3 }
 0x19e   :  { %2673 = vmatmul.bf16.vlgmr.msrb.gmra.mxu0 %v5233_v33 }
 0x19f   :  { %2721 = vmatpush.bf16.msra.mxu0 %v4388_v14 }
 0x1a0   :  { %2715 = vmatmul.bf16.vlgmr.msra.gmra.mxu2 %v5227_v27  ;;  %v4818_v27 = vld [vmem:[#allocation8 + $0x34c] sm:$0xf]  ;;  %3028 = vmatpush.bf16.msrb.mxu1 %v4849_v57 }
 0x1a1   :  { %v4308_v26 = vor.u32 %v4818_v27, %v4305_v4  ;;  %v2534_v7 = vpop.f32.mrf.mxu1  ;;  %3035 = vmatpush.bf16.msrb.mxu2 %v4864_v9  ;;  %v4870_v4 = vld [vmem:[#allocation11 + $0xe8] sm:$0xff] }
 0x1a2   :  { %v2535_v1 = vadd.f32 %v2534_v7, %v2521_v61 }
 0x1a3   :  { %2722 = vmatpush.bf16.msra.mxu0 %v4372_v16 }
 0x1a5   :  { %3036 = vmatpush.bf16.msrb.mxu2 %v4863_v51 }
 0x1a7   :  { %2723 = vmatpush.bf16.msra.mxu0 %v4356_v19  ;;  %v1864_v19 = vperm.slane %v5241_v56, 1 }
 0x1a9   :  { %3037 = vmatpush.bf16.msrb.mxu2 %v4862_v53  ;;  %v2536_v60 = vpop.f32.mrf.mxu1  ;;  %v2576_v63 = vpop.f32.mrf.mxu3 }
 0x1aa   :  { %v2537_v5 = vadd.f32 %v2536_v60, %v2523_v0  ;;  %v2577_v27 = vadd.f32 %v2576_v63, %v1864_v19 }
 0x1ab   :  { %2724 = vmatpush.bf16.msra.mxu0 %v4340_v23 }
 0x1ad   :  { %3038 = vmatpush.bf16.msrb.mxu2 %v4861_v37  ;;  %v4865_v37 = vld [vmem:[#allocation11 + $0xc0] sm:$0xff] }
 0x1af   :  { %2725 = vmatpush.bf16.msra.mxu0 %v4324_v25 }
 0x1b1   :  { %3039 = vmatpush.bf16.msrb.mxu2 %v4860_v42  ;;  %v2590_v3 = vpop.f32.mrf.mxu1  ;;  %v2578_v20 = vpop.f32.mrf.mxu3 }
 0x1b2   :  { %v2591_v50 = vadd.f32 %v2590_v3, %v2577_v27 }
 0x1b3   :  { %2726 = vmatpush.bf16.msra.mxu0 %v4308_v26  ;;  %v2579_v26 = vadd.f32 %v2578_v20, %v1864_v19 }
 0x1b5   :  { %3040 = vmatpush.bf16.msrb.mxu2 %v4859_v2  ;;  %v1866_v2 = vperm.slane %v5241_v56, 3 }
 0x1b7   :  { %2727 = vmatpush.bf16.msra.mxu0 %v4292_v21 }
 0x1b9   :  { %3041 = vmatpush.bf16.msrb.mxu2 %v4858_v13  ;;  %v2592_v23 = vpop.f32.mrf.mxu1 }
 0x1ba   :  { %v2593_v28 = vadd.f32 %v2592_v23, %v2579_v26 }
 0x1bb   :  { %2728 = vmatpush.bf16.msra.mxu0 %v4276_v31 }
 0x1bd   :  { %3042 = vmatpush.bf16.msrb.mxu2 %v4857_v17 }
 0x1be   :  { %2729 = vmatmul.bf16.vlgmr.msra.gmra.mxu0 %v5233_v33  ;;  %v4841_v33 = vld [vmem:[#allocation11] sm:$0xff] }
 0x1bf   :  { %3014 = vmatpush.bf16.msrb.mxu3 %v4841_v33  ;;  %3049 = vmatpush.bf16.msrb.mxu0 %v4872_v18  ;;  %v4867_v33 = vld [vmem:[#allocation11 + $0xd0] sm:$0xff] }
 0x1c2   :  { %v2646_v8 = vpop.f32.mrf.mxu1 }
 0x1c3   :  { %3050 = vmatpush.bf16.msrb.mxu0 %v4871_v55  ;;  %v4891_v55 = vld [vmem:[%s5262_s6] ss:$0 sm:$0xff] }
 0x1c7   :  { %3051 = vmatpush.bf16.msrb.mxu0 %v4870_v4 }
 0x1c9   :  { %v2632_v30 = vpop.f32.mrf.mxu3 }
 0x1ca   :  { %v2633_v9 = vadd.f32 %v2632_v30, %v1865_v43  ;;  %v2648_v7 = vpop.f32.mrf.mxu1 }
 0x1cb   :  { %3052 = vmatpush.bf16.msrb.mxu0 %v4869_v29 }
 0x1cf   :  { %3053 = vmatpush.bf16.msrb.mxu0 %v4868_v41 }
 0x1d1   :  { %v2634_v54 = vpop.f32.mrf.mxu3 }
 0x1d2   :  { %v2635_v47 = vadd.f32 %v2634_v54, %v1865_v43 }
 0x1d3   :  { %3054 = vmatpush.bf16.msrb.mxu0 %v4867_v33 }
 0x1d4   :  { %v2649_v52 = vadd.f32 %v2648_v7, %v2635_v47 }
 0x1d7   :  { %3055 = vmatpush.bf16.msrb.mxu0 %v4866_v49 }
 0x1db   :  { %3056 = vmatpush.bf16.msrb.mxu0 %v4865_v37 }
 0x1dd   :  { %v2548_v48 = vpop.f32.mrf.mxu2 }
 0x1de   :  { %v2549_v6 = vadd.f32 %v2548_v48, %v2535_v1  ;;  %v2647_v48 = vadd.f32 %v2646_v8, %v2633_v9 }
 0x1e4   :  { %v2702_v0 = vpop.f32.mrf.mxu1 }
 0x1e5   :  { %v2550_v59 = vpop.f32.mrf.mxu2 }
 0x1e6   :  { %v2551_v10 = vadd.f32 %v2550_v59, %v2537_v5 }
 0x1e9   :  { %v2688_v61 = vpop.f32.mrf.mxu3 }
 0x1ea   :  { %v2689_v5 = vadd.f32 %v2688_v61, %v1866_v2 }
 0x1ed   :  { %v2604_v11 = vpop.f32.mrf.mxu2 }
 0x1ee   :  { %v2605_v21 = vadd.f32 %v2604_v11, %v2591_v50 }
 0x1f1   :  { %v2690_v63 = vpop.f32.mrf.mxu3 }
 0x1f2   :  { %v2691_v11 = vadd.f32 %v2690_v63, %v1866_v2 }
 0x1f5   :  { %v2606_v24 = vpop.f32.mrf.mxu2 }
 0x1f6   :  { %v2607_v31 = vadd.f32 %v2606_v24, %v2593_v28 }
 0x1fb   :  { %v2562_v62 = vpop.f32.mrf.mxu0 }
 0x1fc   :  { %v2563_v12 = vadd.f32 %v2562_v62, %v2549_v6  ;;  %v2704_v6 = vpop.f32.mrf.mxu1 }
 0x1fd   :  { %v2705_v13 = vadd.f32 %v2704_v6, %v2691_v11 }
 0x1fe   :  { %v2735_v35 = vmax.f32 %v2563_v12, 0.0 }
 0x203   :  { %v2564_v14 = vpop.f32.mrf.mxu0  ;;  %v2660_v36 = vpop.f32.mrf.mxu2 }
 0x204   :  { %v2565_v15 = vadd.f32 %v2564_v14, %v2551_v10  ;;  %v2661_v53 = vadd.f32 %v2660_v36, %v2647_v48  ;;  %v2703_v10 = vadd.f32 %v2702_v0, %v2689_v5 }
 0x206   :  { %v2739_v16 = vmax.f32 %v2565_v15, 0.0 }
 0x208   :  { %v2743_v22 = vpack.c.bf16 %v2739_v16, %v2735_v35 }
 0x20a   :  { %3015 = vmatmul.bf16.vlgmr.msrb.gmra.mxu3 %v2743_v22 }
 0x20b   :  { %v2618_v25 = vpop.f32.mrf.mxu0  ;;  %v2662_v51 = vpop.f32.mrf.mxu2 }
 0x20c   :  { %v2619_v32 = vadd.f32 %v2618_v25, %v2605_v21  ;;  %v2663_v60 = vadd.f32 %v2662_v51, %v2649_v52 }
 0x20e   :  { %v2736_v38 = vmax.f32 %v2619_v32, 0.0 }
 0x213   :  { %v2620_v34 = vpop.f32.mrf.mxu0 }
 0x214   :  { %v2621_v45 = vadd.f32 %v2620_v34, %v2607_v31 }
 0x216   :  { %v2740_v39 = vmax.f32 %v2621_v45, 0.0 }
 0x218   :  { %v2744_v44 = vpack.c.bf16 %v2740_v39, %v2736_v38 }
 0x21a   :  { %3029 = vmatmul.bf16.vlgmr.msrb.gmra.mxu1 %v2744_v44 }
 0x21b   :  { %v2674_v46 = vpop.f32.mrf.mxu0 }
 0x21c   :  { %v2675_v57 = vadd.f32 %v2674_v46, %v2661_v53 }
 0x21e   :  { %v2737_v40 = vmax.f32 %v2675_v57, 0.0 }
 0x223   :  { %v2676_v58 = vpop.f32.mrf.mxu0  ;;  %v2716_v1 = vpop.f32.mrf.mxu2 }
 0x224   :  { %v2677_v59 = vadd.f32 %v2676_v58, %v2663_v60  ;;  %v2717_v14 = vadd.f32 %v2716_v1, %v2703_v10 }
 0x226   :  { %v2741_v42 = vmax.f32 %v2677_v59, 0.0 }
 0x228   :  { %v2745_v62 = vpack.c.bf16 %v2741_v42, %v2737_v40 }
 0x22a   :  { %3043 = vmatmul.bf16.vlgmr.msrb.gmra.mxu2 %v2745_v62 }
 0x22b   :  { %v2718_v12 = vpop.f32.mrf.mxu2 }
 0x22c   :  { %v2719_v15 = vadd.f32 %v2718_v12, %v2705_v13 }
 0x23b   :  { %v2730_v3 = vpop.f32.mrf.mxu0 }
 0x23c   :  { %v2731_v35 = vadd.f32 %v2730_v3, %v2717_v14 }
 0x23e   :  { %v2738_v18 = vmax.f32 %v2731_v35, 0.0 }
 0x243   :  { %v2732_v16 = vpop.f32.mrf.mxu0 }
 0x244   :  { %v2733_v17 = vadd.f32 %v2732_v16, %v2719_v15 }
 0x246   :  { %v2742_v19 = vmax.f32 %v2733_v17, 0.0 }
 0x248   :  { %v2746_v22 = vpack.c.bf16 %v2742_v19, %v2738_v18 }
 0x24a   :  { %3057 = vmatmul.bf16.vlgmr.msrb.gmra.mxu0 %v2746_v22 }
 0x28d   :  { %v3016_v20 = vpop.f32.mrf.mxu3 }
 0x28e   :  { %v3017_v4 = vadd.f32 %v4891_v55, %v3016_v20 }
 0x295   :  { %v3018_v24 = vpop.f32.mrf.mxu3 }
 0x296   :  { %v3019_v26 = vadd.f32 %v4891_v55, %v3018_v24 }
 0x297   :  { %v3030_v23 = vpop.f32.mrf.mxu1 }
 0x298   :  { %v3031_v28 = vadd.f32 %v3030_v23, %v3017_v4 }
 0x29f   :  { %v3032_v27 = vpop.f32.mrf.mxu1 }
 0x2a0   :  { %v3033_v21 = vadd.f32 %v3032_v27, %v3019_v26 }
 0x2ad   :  { %v3044_v56 = vpop.f32.mrf.mxu2 }
 0x2ae   :  { %v3045_v29 = vadd.f32 %v3044_v56, %v3031_v28 }
 0x2b5   :  { %v3046_v50 = vpop.f32.mrf.mxu2 }
 0x2b6   :  { %v3047_v30 = vadd.f32 %v3046_v50, %v3033_v21 }
 0x2c7   :  { %v3058_v25 = vpop.f32.mrf.mxu0 }
 0x2c8   :  { %v3059_v32 = vadd.f32 %v3058_v25, %v3045_v29 }
 0x2cf   :  { %v3060_v31 = vpop.f32.mrf.mxu0 }
 0x2d0   :  { %v3061_v8 = vadd.f32 %v3060_v31, %v3047_v30 }
 0x2d2   :  { %v4876_v34 = vpack.c.bf16 %v3061_v8, %v3059_v32 }
 0x2d4   :  { %4877 = vst [vmem:[#allocation13] sm:$0xff] %v4876_v34  }
 0x2d5   :  { %3079 = dma.vmem_to_hbm [thread:$0]  %s3072_s11, 128, %s3074_s14, [#allocation4], %s5080_s8, %s5080_s8, %s5081_s9  }
 0x2d6   :  { %5068 = dma.done.wait [#allocation4], 128  }
 0x2d7   :  { %5069 = vsyncadd [#allocation4], 4294967168 }
 0x2d8   :  { %3084 = vsyncpa [#allocation3], 1 }
 0x2d9   :  { %3085 = vsyncpa [#allocation6], 1 }
 0x2da   :  { %3086 = vsyncpa [#allocation9], 1 }
 0x2db   :  { %3087 = vsyncpa [#allocation12], 1 }
 0x2dc   :  { %3088 = vsyncpa [#allocation4], 1 }

</bundles_post_ra>
